<compile_context>
chip_gen: v7x
topology: tpu7x:2x2x1
jax: 0.10.0
libtpu: 0.0.40
codegen_flags: <defaults>
</compile_context>

<pallas_src>
import functools

import jax
import jax.numpy as jnp
from jax import lax
from jax.experimental import pallas as pl
from jax.experimental.pallas import tpu as pltpu


def _round_up(x, m):
    return (x + m - 1) // m * m


_UNROLL_THRESHOLD = 16   # fully unroll the recurrence for T <= this


# ----------------------------------------------------------------------------
# Shared decoder body: one-hot embed -> hoisted input projection (to scratch)
# -> GRU recurrence -> hoisted lane-dense output projection.
# ----------------------------------------------------------------------------
def _decode_body(h0, ids_ref, emb_ref, wi_ref, bi_ref, wh_ref, bhn_ref,
                 wout_ref, bout_ref, logits_ref, hT_ref, gi_ref, h_all,
                 *, T, B_pad, H_pad):
    f32 = jnp.float32
    bf16 = jnp.bfloat16
    G = H_pad                           # per-gate 128-lane group width

    # -- char embedding as a one-hot matmul (bf16 one-hot, exact 0/1) --
    ids = ids_ref[...]                                      # (T*B_pad, 1) i32
    c_rows = emb_ref.shape[0]
    iota = lax.broadcasted_iota(jnp.int32, (T * B_pad, c_rows), 1)
    onehot = (iota == ids).astype(bf16)                     # (T*B_pad, c_rows)
    x_emb = jnp.dot(onehot, emb_ref[...],
                    preferred_element_type=f32)             # (T*B_pad, E) f32

    # -- hoisted input projection for all timesteps, written to VMEM scratch --
    gi_ref[...] = (jnp.dot(x_emb.astype(bf16), wi_ref[...],
                           preferred_element_type=f32) + bi_ref[...])

    wh = wh_ref[...]        # (H_pad, 3*H_pad) bf16 fused hidden-gate weights
    b_hn = bhn_ref[...]     # (1, H_pad) f32; must stay inside r * (...) term

    def gru_step(gi, h):
        gh = jnp.dot(h.astype(bf16), wh, preferred_element_type=f32)
        r = jax.nn.sigmoid(gi[:, 0:G] + gh[:, 0:G])
        z = jax.nn.sigmoid(gi[:, G:2 * G] + gh[:, G:2 * G])
        n = jnp.tanh(gi[:, 2 * G:3 * G] + r * (gh[:, 2 * G:3 * G] + b_hn))
        return (1.0 - z) * n + z * h

    h = h0                                                  # (B_pad, H_pad) f32
    if T <= _UNROLL_THRESHOLD:
        # static unroll; every slice/store is an aligned (8, 128k) tile
        for t in range(T):
            row = t * B_pad
            h = gru_step(gi_ref[row:row + B_pad, :], h)
            h_all[row:row + B_pad, :] = h
    else:
        def body(t, h):
            row = pl.multiple_of(t * B_pad, 8)
            h = gru_step(gi_ref[pl.ds(row, B_pad), :], h)
            h_all[pl.ds(row, B_pad), :] = h
            return h
        h = lax.fori_loop(0, T, body, h, unroll=4)

    # -- hoisted, lane-dense output projection over all timesteps --
    logits_ref[...] = (jnp.dot(h_all[...].astype(bf16), wout_ref[...],
                               preferred_element_type=f32) + bout_ref[...])
    hT_ref[...] = h


def _head_decode_kernel(x_ref, head_w_ref, head_b_ref, gamma_ref, beta_ref,
                        ids_ref, emb_ref, wi_ref, bi_ref, wh_ref, bhn_ref,
                        wout_ref, bout_ref, logits_ref, hT_ref, gi_ref, h_all,
                        *, T, B, B_pad, H_pad):
    f32 = jnp.float32
    # head: Linear + ReLU + BatchNorm1d (training-mode batch stats, eps=1e-5)
    x = x_ref[...]                                          # (B_pad, E_in) f32
    y = jnp.dot(x.astype(jnp.bfloat16), head_w_ref[...],
                preferred_element_type=f32) + head_b_ref[...]
    y = jnp.maximum(y, 0.0)
    # mask padded batch rows out of the statistics; divide by the true B
    valid = (lax.broadcasted_iota(jnp.int32, (B_pad, 1), 0) < B).astype(f32)
    inv_b = 1.0 / B
    mean = jnp.sum(y * valid, axis=0, keepdims=True) * inv_b
    cent = (y - mean) * valid
    var = jnp.sum(cent * cent, axis=0, keepdims=True) * inv_b
    h0 = gamma_ref[...] * ((y - mean) * lax.rsqrt(var + 1e-5)) + beta_ref[...]
    h0 = h0 * valid      # keep padded rows exactly zero entering the GRU
    _decode_body(h0, ids_ref, emb_ref, wi_ref, bi_ref, wh_ref, bhn_ref,
                 wout_ref, bout_ref, logits_ref, hT_ref, gi_ref, h_all,
                 T=T, B_pad=B_pad, H_pad=H_pad)


def _decode_kernel(h0_ref, ids_ref, emb_ref, wi_ref, bi_ref, wh_ref, bhn_ref,
                   wout_ref, bout_ref, logits_ref, hT_ref, gi_ref, h_all,
                   *, T, B_pad, H_pad):
    _decode_body(h0_ref[...], ids_ref, emb_ref, wi_ref, bi_ref, wh_ref, bhn_ref,
                 wout_ref, bout_ref, logits_ref, hT_ref, gi_ref, h_all,
                 T=T, B_pad=B_pad, H_pad=H_pad)


# ----------------------------------------------------------------------------
# Forward wrapper (single fused pallas_call; param fusing/padding runs once
# under jit and is trivially small).
# ----------------------------------------------------------------------------
@functools.partial(jax.jit, static_argnames=("use_head",))
def char_decoder_head_rnn_forward(params, hidden, char_ids, use_head=True):
    """hidden: (B, E_in) word embeddings if use_head else (1, B, H) hidden.
    char_ids: (T, B) int32 dense char sequence (stand-in for PackedSequence).
    Returns (logits (T, B, C), h_final (1, B, H))."""
    T, B = char_ids.shape
    H, C = params["out_w"].shape
    E = params["char_emb"].shape[1]

    f32, bf16 = jnp.float32, jnp.bfloat16
    B_pad = _round_up(B, 8)          # sublane-aligned batch tiles
    H_pad = _round_up(H, 128)        # each gate gets its own 128-lane group
    G3 = 3 * H_pad
    c_rows = _round_up(C, 8)         # one-hot K dim
    c_pad = _round_up(C, 128)        # lane-dense logits

    (wir, wiz, win, whr, whz, whn,
     bir, biz, bin_, bhr, bhz, bhn) = params["gru"]

    # Fused, per-gate-lane-group-aligned gate weights (zero padded), bf16.
    def place_gates(mats, rows):
        w = jnp.zeros((rows, G3), f32)
        for g, m in enumerate(mats):
            w = w.at[:m.shape[0], g * H_pad:g * H_pad + H].set(m)
        return w.astype(bf16)

    w_i = place_gates([wir, wiz, win], E)          # (E, 3*H_pad)
    w_h = place_gates([whr, whz, whn], H_pad)      # (H_pad, 3*H_pad)

    # Pre-folded biases (b_r = b_ir+b_hr, b_z = b_iz+b_hz); b_hn stays separate.
    b_i = jnp.zeros((1, G3), f32)
    b_i = b_i.at[:, 0:H].set(bir + bhr)
    b_i = b_i.at[:, H_pad:H_pad + H].set(biz + bhz)
    b_i = b_i.at[:, 2 * H_pad:2 * H_pad + H].set(bin_)
    bhn_p = jnp.zeros((1, H_pad), f32).at[:, :H].set(bhn)

    emb_p = jnp.zeros((c_rows, E), f32).at[:C].set(params["char_emb"]).astype(bf16)
    wout_p = jnp.zeros((H_pad, c_pad), f32).at[:H, :C].set(params["out_w"]).astype(bf16)
    bout_p = jnp.zeros((1, c_pad), f32).at[:, :C].set(params["out_b"])

    ids_p = jnp.zeros((T, B_pad), jnp.int32).at[:, :B].set(char_ids.astype(jnp.int32))
    ids2d = ids_p.reshape(T * B_pad, 1)

    common = (ids2d, emb_p, w_i, b_i, w_h, bhn_p, wout_p, bout_p)

    if use_head:
        Ein = hidden.shape[1]
        x_p = jnp.zeros((B_pad, Ein), f32).at[:B].set(hidden)
        head_w = jnp.zeros((Ein, H_pad), f32).at[:, :H].set(params["head_w"]).astype(bf16)
        head_b = jnp.zeros((1, H_pad), f32).at[:, :H].set(params["head_b"])
        gamma = jnp.zeros((1, H_pad), f32).at[:, :H].set(params["bn_gamma"])
        beta = jnp.zeros((1, H_pad), f32).at[:, :H].set(params["bn_beta"])
        kernel = functools.partial(_head_decode_kernel, T=T, B=B,
                                   B_pad=B_pad, H_pad=H_pad)
        args = (x_p, head_w, head_b, gamma, beta) + common
    else:
        h0_p = jnp.zeros((B_pad, H_pad), f32).at[:B, :H].set(hidden[0])
        kernel = functools.partial(_decode_kernel, T=T, B_pad=B_pad, H_pad=H_pad)
        args = (h0_p,) + common

    # Explicit VMEM budget (v5e's scoped default is only 16 MiB); estimate the
    # resident slabs and leave 2x headroom, capped well below physical VMEM.
    est_bytes = (4 * T * B_pad * (G3 + H_pad + c_pad + 1)        # gi, h_all, logits, ids
                 + 2 * (E * G3 + H_pad * G3 + H_pad * c_pad + c_rows * E)
                 + 4 * (B_pad * H_pad + 8 * G3))
    vmem_limit = int(min(max(2 * est_bytes, 32 * 1024 * 1024), 96 * 1024 * 1024))

    logits_pad, h_final = pl.pallas_call(
        kernel,
        out_shape=(jax.ShapeDtypeStruct((T * B_pad, c_pad), f32),
                   jax.ShapeDtypeStruct((B_pad, H_pad), f32)),
        scratch_shapes=[pltpu.VMEM((T * B_pad, G3), f32),     # gi_all
                        pltpu.VMEM((T * B_pad, H_pad), f32)], # h_all
        compiler_params=pltpu.CompilerParams(vmem_limit_bytes=vmem_limit),
    )(*args)

    logits = logits_pad.reshape(T, B_pad, c_pad)[:, :B, :C]
    return logits, h_final[:B, :H][None, :, :]


# ----------------------------------------------------------------------------
# Pure-JAX reference (for correctness check)
# ----------------------------------------------------------------------------
def reference_forward(params, hidden, char_ids, use_head=True):
    if use_head:
        y = hidden @ params["head_w"] + params["head_b"]
        y = jnp.maximum(y, 0.0)
        mean = jnp.mean(y, axis=0, keepdims=True)
        var = jnp.mean((y - mean) ** 2, axis=0, keepdims=True)
        h = (params["bn_gamma"] * (y - mean) / jnp.sqrt(var + 1e-5)
             + params["bn_beta"])
    else:
        h = hidden[0]
    (wir, wiz, win, whr, whz, whn, bir, biz, bin_, bhr, bhz, bhn) = params["gru"]
    x_emb = jnp.take(params["char_emb"], char_ids, axis=0)        # (T, B, E)
    logits = []
    for t in range(char_ids.shape[0]):
        x = x_emb[t]
        r = jax.nn.sigmoid(x @ wir + bir + h @ whr + bhr)
        z = jax.nn.sigmoid(x @ wiz + biz + h @ whz + bhz)
        n = jnp.tanh(x @ win + bin_ + r * (h @ whn + bhn))
        h = (1.0 - z) * n + z * h
        logits.append(h @ params["out_w"] + params["out_b"])
    return jnp.stack(logits, axis=0), h[None]


# ----------------------------------------------------------------------------
# Deterministic parameter construction
# ----------------------------------------------------------------------------
def make_params(key, hidden_size, char_count, char_embedding_size,
                input_embedding_size):
    ks = jax.random.split(key, 15)
    s = 0.1
    H, C, E, Ein = hidden_size, char_count, char_embedding_size, input_embedding_size
    gru = (
        jax.random.normal(ks[0], (E, H), jnp.float32) * s,   # W_ir^T
        jax.random.normal(ks[1], (E, H), jnp.float32) * s,   # W_iz^T
        jax.random.normal(ks[2], (E, H), jnp.float32) * s,   # W_in^T
        jax.random.normal(ks[3], (H, H), jnp.float32) * s,   # W_hr^T
        jax.random.normal(ks[4], (H, H), jnp.float32) * s,   # W_hz^T
        jax.random.normal(ks[5], (H, H), jnp.float32) * s,   # W_hn^T
        jax.random.normal(ks[6], (1, H), jnp.float32) * s,   # b_ir
        jax.random.normal(ks[7], (1, H), jnp.float32) * s,   # b_iz
        jax.random.normal(ks[8], (1, H), jnp.float32) * s,   # b_in
        jax.random.normal(ks[9], (1, H), jnp.float32) * s,   # b_hr
        jax.random.normal(ks[10], (1, H), jnp.float32) * s,  # b_hz
        jax.random.normal(ks[11], (1, H), jnp.float32) * s,  # b_hn
    )
    return {
        "head_w": jax.random.normal(ks[12], (Ein, H), jnp.float32) * s,
        "head_b": jnp.zeros((1, H), jnp.float32),
        "bn_gamma": jnp.ones((1, H), jnp.float32),
        "bn_beta": jnp.zeros((1, H), jnp.float32),
        "char_emb": jax.random.normal(ks[13], (C, E), jnp.float32) * s,
        "gru": gru,
        "out_w": jax.random.normal(ks[14], (H, C), jnp.float32) * s,
        "out_b": jnp.zeros((1, C), jnp.float32),
    }


if __name__ == "__main__":
    hidden_size = 32
    char_count = 28
    char_embedding_size = 32
    input_embedding_size = 32
    B, T = 4, 8

    key = jax.random.PRNGKey(0)
    k_p, k_h, k_c, k_h2 = jax.random.split(key, 4)
    params = make_params(k_p, hidden_size, char_count, char_embedding_size,
                         input_embedding_size)

    word_emb = jax.random.normal(k_h, (B, input_embedding_size), jnp.float32)
    char_ids = jax.random.randint(k_c, (T, B), 0, char_count, jnp.int32)

    # Kernel uses bf16 MXU operands (f32 accumulate + f32 gate math), so allow
    # a slightly looser tolerance vs. the f32 reference.
    TOL = 2e-2

    # use_head=True path (word embedding -> head -> GRU decode)
    logits, h_final = char_decoder_head_rnn_forward(
        params, word_emb, char_ids, use_head=True)
    jax.block_until_ready((logits, h_final))
    assert logits.shape == (T, B, char_count)
    assert h_final.shape == (1, B, hidden_size)

    ref_logits, ref_h = reference_forward(params, word_emb, char_ids,
                                          use_head=True)
    assert float(jnp.max(jnp.abs(logits - ref_logits))) < TOL
    assert float(jnp.max(jnp.abs(h_final - ref_h))) < TOL

    # use_head=False path (hidden passed directly to the decoder)
    h0_direct = jax.random.normal(k_h2, (1, B, hidden_size), jnp.float32)
    logits2, h_final2 = char_decoder_head_rnn_forward(
        params, h0_direct, char_ids, use_head=False)
    jax.block_until_ready((logits2, h_final2))
    ref_logits2, ref_h2 = reference_forward(params, h0_direct, char_ids,
                                            use_head=False)
    assert float(jnp.max(jnp.abs(logits2 - ref_logits2))) < TOL
    assert float(jnp.max(jnp.abs(h_final2 - ref_h2))) < TOL

    print("KERNEL_OK")
</pallas_src>

<mosaic_0001>
module attributes {stable_mosaic.version = 11 : i64} {
  func.func @_head_decode_kernel(%arg0: memref<8x32xf32, #tpu.memory_space<vmem>>, %arg1: memref<32x128xbf16, #tpu.memory_space<vmem>>, %arg2: memref<1x128xf32, #tpu.memory_space<vmem>>, %arg3: memref<1x128xf32, #tpu.memory_space<vmem>>, %arg4: memref<1x128xf32, #tpu.memory_space<vmem>>, %arg5: memref<64x1xi32, #tpu.memory_space<vmem>>, %arg6: memref<32x32xbf16, #tpu.memory_space<vmem>>, %arg7: memref<32x384xbf16, #tpu.memory_space<vmem>>, %arg8: memref<1x384xf32, #tpu.memory_space<vmem>>, %arg9: memref<128x384xbf16, #tpu.memory_space<vmem>>, %arg10: memref<1x128xf32, #tpu.memory_space<vmem>>, %arg11: memref<128x128xbf16, #tpu.memory_space<vmem>>, %arg12: memref<1x128xf32, #tpu.memory_space<vmem>>, %arg13: memref<64x128xf32, #tpu.memory_space<vmem>>, %arg14: memref<8x128xf32, #tpu.memory_space<vmem>>, %arg15: memref<64x384xf32, #tpu.memory_space<vmem>>, %arg16: memref<64x128xf32, #tpu.memory_space<vmem>>) attributes {dimension_semantics = [], scalar_prefetch = 0 : i64, scratch_operands = 2 : i64, tpu.core_type = #tpu.core_type<tc>} {
    %c0 = arith.constant 0 : index
    %c0_0 = arith.constant 0 : index
    %0 = vector.load %arg0[%c0, %c0_0] : memref<8x32xf32, #tpu.memory_space<vmem>>, vector<8x32xf32>
    %1 = arith.truncf %0 : vector<8x32xf32> to vector<8x32xbf16>
    %c0_1 = arith.constant 0 : index
    %c0_2 = arith.constant 0 : index
    %2 = vector.load %arg1[%c0_1, %c0_2] : memref<32x128xbf16, #tpu.memory_space<vmem>>, vector<32x128xbf16>
    %cst = arith.constant dense<0.000000e+00> : vector<8x128xf32>
    %3 = tpu.matmul %1, %2, %cst {dimension_numbers = #tpu.dot_dimension_numbers<[1], [0], [0], [1], [0, 0, 1, 1], [], []>} : vector<8x32xbf16>, vector<32x128xbf16>, vector<8x128xf32> -> vector<8x128xf32>
    %c0_3 = arith.constant 0 : index
    %c0_4 = arith.constant 0 : index
    %4 = vector.load %arg2[%c0_3, %c0_4] : memref<1x128xf32, #tpu.memory_space<vmem>>, vector<1x128xf32>
    %5 = vector.broadcast %4 : vector<1x128xf32> to vector<8x128xf32>
    %6 = arith.addf %3, %5 : vector<8x128xf32>
    %cst_5 = arith.constant 0.000000e+00 : f32
    %7 = vector.broadcast %cst_5 : f32 to vector<8x128xf32>
    %8 = arith.maximumf %6, %7 : vector<8x128xf32>
    %9 = tpu.iota {dimensions = array<i32: 0>} : vector<8x1xi32>
    %c4_i32 = arith.constant 4 : i32
    %10 = vector.broadcast %c4_i32 : i32 to vector<8x1xi32>
    %11 = arith.cmpi slt, %9, %10 : vector<8x1xi32>
    %12 = arith.extui %11 : vector<8x1xi1> to vector<8x1xi32>
    %13 = arith.sitofp %12 : vector<8x1xi32> to vector<8x1xf32>
    %14 = vector.broadcast %13 : vector<8x1xf32> to vector<8x128xf32>
    %15 = arith.mulf %8, %14 : vector<8x128xf32>
    %cst_6 = arith.constant dense<0.000000e+00> : vector<128xf32>
    %16 = vector.multi_reduction <add>, %15, %cst_6 [0] : vector<8x128xf32> to vector<128xf32>
    %17 = vector.shape_cast %16 : vector<128xf32> to vector<1x128xf32>
    %cst_7 = arith.constant 2.500000e-01 : f32
    %18 = vector.broadcast %cst_7 : f32 to vector<1x128xf32>
    %19 = arith.mulf %17, %18 : vector<1x128xf32>
    %20 = vector.broadcast %19 : vector<1x128xf32> to vector<8x128xf32>
    %21 = arith.subf %8, %20 : vector<8x128xf32>
    %22 = vector.broadcast %13 : vector<8x1xf32> to vector<8x128xf32>
    %23 = arith.mulf %21, %22 : vector<8x128xf32>
    %24 = arith.mulf %23, %23 : vector<8x128xf32>
    %cst_8 = arith.constant dense<0.000000e+00> : vector<128xf32>
    %25 = vector.multi_reduction <add>, %24, %cst_8 [0] : vector<8x128xf32> to vector<128xf32>
    %26 = vector.shape_cast %25 : vector<128xf32> to vector<1x128xf32>
    %cst_9 = arith.constant 2.500000e-01 : f32
    %27 = vector.broadcast %cst_9 : f32 to vector<1x128xf32>
    %28 = arith.mulf %26, %27 : vector<1x128xf32>
    %c0_10 = arith.constant 0 : index
    %c0_11 = arith.constant 0 : index
    %29 = vector.load %arg3[%c0_10, %c0_11] : memref<1x128xf32, #tpu.memory_space<vmem>>, vector<1x128xf32>
    %30 = vector.broadcast %19 : vector<1x128xf32> to vector<8x128xf32>
    %31 = arith.subf %8, %30 : vector<8x128xf32>
    %cst_12 = arith.constant 9.99999974E-6 : f32
    %32 = vector.broadcast %cst_12 : f32 to vector<1x128xf32>
    %33 = arith.addf %28, %32 : vector<1x128xf32>
    %34 = math.rsqrt %33 : vector<1x128xf32>
    %35 = vector.broadcast %34 : vector<1x128xf32> to vector<8x128xf32>
    %36 = arith.mulf %31, %35 : vector<8x128xf32>
    %37 = vector.broadcast %29 : vector<1x128xf32> to vector<8x128xf32>
    %38 = arith.mulf %37, %36 : vector<8x128xf32>
    %c0_13 = arith.constant 0 : index
    %c0_14 = arith.constant 0 : index
    %39 = vector.load %arg4[%c0_13, %c0_14] : memref<1x128xf32, #tpu.memory_space<vmem>>, vector<1x128xf32>
    %40 = vector.broadcast %39 : vector<1x128xf32> to vector<8x128xf32>
    %41 = arith.addf %38, %40 : vector<8x128xf32>
    %42 = vector.broadcast %13 : vector<8x1xf32> to vector<8x128xf32>
    %43 = arith.mulf %41, %42 : vector<8x128xf32>
    %c0_15 = arith.constant 0 : index
    %c0_16 = arith.constant 0 : index
    %44 = vector.load %arg5[%c0_15, %c0_16] : memref<64x1xi32, #tpu.memory_space<vmem>>, vector<64x1xi32>
    %45 = tpu.iota {dimensions = array<i32: 1>} : vector<64x32xi32>
    %46 = vector.broadcast %44 : vector<64x1xi32> to vector<64x32xi32>
    %47 = arith.cmpi eq, %45, %46 : vector<64x32xi32>
    %48 = arith.extui %47 : vector<64x32xi1> to vector<64x32xi32>
    %49 = arith.sitofp %48 : vector<64x32xi32> to vector<64x32xf32>
    %50 = arith.truncf %49 : vector<64x32xf32> to vector<64x32xbf16>
    %c0_17 = arith.constant 0 : index
    %c0_18 = arith.constant 0 : index
    %51 = vector.load %arg6[%c0_17, %c0_18] : memref<32x32xbf16, #tpu.memory_space<vmem>>, vector<32x32xbf16>
    %cst_19 = arith.constant dense<0.000000e+00> : vector<64x32xf32>
    %52 = tpu.matmul %50, %51, %cst_19 {dimension_numbers = #tpu.dot_dimension_numbers<[1], [0], [0], [1], [0, 0, 1, 1], [], []>} : vector<64x32xbf16>, vector<32x32xbf16>, vector<64x32xf32> -> vector<64x32xf32>
    %53 = arith.truncf %52 : vector<64x32xf32> to vector<64x32xbf16>
    %c0_20 = arith.constant 0 : index
    %c0_21 = arith.constant 0 : index
    %54 = vector.load %arg7[%c0_20, %c0_21] : memref<32x384xbf16, #tpu.memory_space<vmem>>, vector<32x384xbf16>
    %cst_22 = arith.constant dense<0.000000e+00> : vector<64x384xf32>
    %55 = tpu.matmul %53, %54, %cst_22 {dimension_numbers = #tpu.dot_dimension_numbers<[1], [0], [0], [1], [0, 0, 1, 1], [], []>} : vector<64x32xbf16>, vector<32x384xbf16>, vector<64x384xf32> -> vector<64x384xf32>
    %c0_23 = arith.constant 0 : index
    %c0_24 = arith.constant 0 : index
    %56 = vector.load %arg8[%c0_23, %c0_24] : memref<1x384xf32, #tpu.memory_space<vmem>>, vector<1x384xf32>
    %57 = vector.broadcast %56 : vector<1x384xf32> to vector<64x384xf32>
    %58 = arith.addf %55, %57 : vector<64x384xf32>
    %c0_25 = arith.constant 0 : index
    %c0_26 = arith.constant 0 : index
    %59 = vector.load %arg15[%c0_25, %c0_26] : memref<64x384xf32, #tpu.memory_space<vmem>>, vector<64x384xf32>
    tpu.vector_store %arg15[%c0_25, %c0_26], %58 {strides = array<i32>} : memref<64x384xf32, #tpu.memory_space<vmem>>, vector<64x384xf32>,
    %c0_27 = arith.constant 0 : index
    %c0_28 = arith.constant 0 : index
    %60 = vector.load %arg9[%c0_27, %c0_28] : memref<128x384xbf16, #tpu.memory_space<vmem>>, vector<128x384xbf16>
    %c0_29 = arith.constant 0 : index
    %c0_30 = arith.constant 0 : index
    %61 = vector.load %arg10[%c0_29, %c0_30] : memref<1x128xf32, #tpu.memory_space<vmem>>, vector<1x128xf32>
    %c0_31 = arith.constant 0 : index
    %c0_32 = arith.constant 0 : index
    %62 = vector.load %arg15[%c0_31, %c0_32] : memref<64x384xf32, #tpu.memory_space<vmem>>, vector<8x384xf32>
    %63 = arith.truncf %43 : vector<8x128xf32> to vector<8x128xbf16>
    %cst_33 = arith.constant dense<0.000000e+00> : vector<8x384xf32>
    %64 = tpu.matmul %63, %60, %cst_33 {dimension_numbers = #tpu.dot_dimension_numbers<[1], [0], [0], [1], [0, 0, 1, 1], [], []>} : vector<8x128xbf16>, vector<128x384xbf16>, vector<8x384xf32> -> vector<8x384xf32>
    %65 = vector.extract_strided_slice %62 {offsets = [0, 0], sizes = [8, 128], strides = [1, 1]} : vector<8x384xf32> to vector<8x128xf32>
    %66 = vector.extract_strided_slice %64 {offsets = [0, 0], sizes = [8, 128], strides = [1, 1]} : vector<8x384xf32> to vector<8x128xf32>
    %67 = arith.addf %65, %66 : vector<8x128xf32>
    %68 = arith.negf %67 : vector<8x128xf32>
    %69 = math.exp %68 : vector<8x128xf32>
    %cst_34 = arith.constant 1.000000e+00 : f32
    %70 = vector.broadcast %cst_34 : f32 to vector<8x128xf32>
    %71 = arith.addf %70, %69 : vector<8x128xf32>
    %72 = arith.divf %70, %71 : vector<8x128xf32>
    %73 = vector.extract_strided_slice %62 {offsets = [0, 128], sizes = [8, 128], strides = [1, 1]} : vector<8x384xf32> to vector<8x128xf32>
    %74 = vector.extract_strided_slice %64 {offsets = [0, 128], sizes = [8, 128], strides = [1, 1]} : vector<8x384xf32> to vector<8x128xf32>
    %75 = arith.addf %73, %74 : vector<8x128xf32>
    %76 = arith.negf %75 : vector<8x128xf32>
    %77 = math.exp %76 : vector<8x128xf32>
    %cst_35 = arith.constant 1.000000e+00 : f32
    %78 = vector.broadcast %cst_35 : f32 to vector<8x128xf32>
    %79 = arith.addf %78, %77 : vector<8x128xf32>
    %80 = arith.divf %78, %79 : vector<8x128xf32>
    %81 = vector.extract_strided_slice %62 {offsets = [0, 256], sizes = [8, 128], strides = [1, 1]} : vector<8x384xf32> to vector<8x128xf32>
    %82 = vector.extract_strided_slice %64 {offsets = [0, 256], sizes = [8, 128], strides = [1, 1]} : vector<8x384xf32> to vector<8x128xf32>
    %83 = vector.broadcast %61 : vector<1x128xf32> to vector<8x128xf32>
    %84 = arith.addf %82, %83 : vector<8x128xf32>
    %85 = arith.mulf %72, %84 : vector<8x128xf32>
    %86 = arith.addf %81, %85 : vector<8x128xf32>
    %87 = math.tanh %86 : vector<8x128xf32>
    %cst_36 = arith.constant 1.000000e+00 : f32
    %88 = vector.broadcast %cst_36 : f32 to vector<8x128xf32>
    %89 = arith.subf %88, %80 : vector<8x128xf32>
    %90 = arith.mulf %89, %87 : vector<8x128xf32>
    %91 = arith.mulf %80, %43 : vector<8x128xf32>
    %92 = arith.addf %90, %91 : vector<8x128xf32>
    %c0_37 = arith.constant 0 : index
    %c0_38 = arith.constant 0 : index
    %93 = vector.load %arg16[%c0_37, %c0_38] : memref<64x128xf32, #tpu.memory_space<vmem>>, vector<8x128xf32>
    tpu.vector_store %arg16[%c0_37, %c0_38], %92 {strides = array<i32>} : memref<64x128xf32, #tpu.memory_space<vmem>>, vector<8x128xf32>,
    %c8 = arith.constant 8 : index
    %c0_39 = arith.constant 0 : index
    %94 = vector.load %arg15[%c8, %c0_39] : memref<64x384xf32, #tpu.memory_space<vmem>>, vector<8x384xf32>
    %95 = arith.truncf %92 : vector<8x128xf32> to vector<8x128xbf16>
    %cst_40 = arith.constant dense<0.000000e+00> : vector<8x384xf32>
    %96 = tpu.matmul %95, %60, %cst_40 {dimension_numbers = #tpu.dot_dimension_numbers<[1], [0], [0], [1], [0, 0, 1, 1], [], []>} : vector<8x128xbf16>, vector<128x384xbf16>, vector<8x384xf32> -> vector<8x384xf32>
    %97 = vector.extract_strided_slice %94 {offsets = [0, 0], sizes = [8, 128], strides = [1, 1]} : vector<8x384xf32> to vector<8x128xf32>
    %98 = vector.extract_strided_slice %96 {offsets = [0, 0], sizes = [8, 128], strides = [1, 1]} : vector<8x384xf32> to vector<8x128xf32>
    %99 = arith.addf %97, %98 : vector<8x128xf32>
    %100 = arith.negf %99 : vector<8x128xf32>
    %101 = math.exp %100 : vector<8x128xf32>
    %cst_41 = arith.constant 1.000000e+00 : f32
    %102 = vector.broadcast %cst_41 : f32 to vector<8x128xf32>
    %103 = arith.addf %102, %101 : vector<8x128xf32>
    %104 = arith.divf %102, %103 : vector<8x128xf32>
    %105 = vector.extract_strided_slice %94 {offsets = [0, 128], sizes = [8, 128], strides = [1, 1]} : vector<8x384xf32> to vector<8x128xf32>
    %106 = vector.extract_strided_slice %96 {offsets = [0, 128], sizes = [8, 128], strides = [1, 1]} : vector<8x384xf32> to vector<8x128xf32>
    %107 = arith.addf %105, %106 : vector<8x128xf32>
    %108 = arith.negf %107 : vector<8x128xf32>
    %109 = math.exp %108 : vector<8x128xf32>
    %cst_42 = arith.constant 1.000000e+00 : f32
    %110 = vector.broadcast %cst_42 : f32 to vector<8x128xf32>
    %111 = arith.addf %110, %109 : vector<8x128xf32>
    %112 = arith.divf %110, %111 : vector<8x128xf32>
    %113 = vector.extract_strided_slice %94 {offsets = [0, 256], sizes = [8, 128], strides = [1, 1]} : vector<8x384xf32> to vector<8x128xf32>
    %114 = vector.extract_strided_slice %96 {offsets = [0, 256], sizes = [8, 128], strides = [1, 1]} : vector<8x384xf32> to vector<8x128xf32>
    %115 = vector.broadcast %61 : vector<1x128xf32> to vector<8x128xf32>
    %116 = arith.addf %114, %115 : vector<8x128xf32>
    %117 = arith.mulf %104, %116 : vector<8x128xf32>
    %118 = arith.addf %113, %117 : vector<8x128xf32>
    %119 = math.tanh %118 : vector<8x128xf32>
    %cst_43 = arith.constant 1.000000e+00 : f32
    %120 = vector.broadcast %cst_43 : f32 to vector<8x128xf32>
    %121 = arith.subf %120, %112 : vector<8x128xf32>
    %122 = arith.mulf %121, %119 : vector<8x128xf32>
    %123 = arith.mulf %112, %92 : vector<8x128xf32>
    %124 = arith.addf %122, %123 : vector<8x128xf32>
    %c8_44 = arith.constant 8 : index
    %c0_45 = arith.constant 0 : index
    %125 = vector.load %arg16[%c8_44, %c0_45] : memref<64x128xf32, #tpu.memory_space<vmem>>, vector<8x128xf32>
    tpu.vector_store %arg16[%c8_44, %c0_45], %124 {strides = array<i32>} : memref<64x128xf32, #tpu.memory_space<vmem>>, vector<8x128xf32>,
    %c16 = arith.constant 16 : index
    %c0_46 = arith.constant 0 : index
    %126 = vector.load %arg15[%c16, %c0_46] : memref<64x384xf32, #tpu.memory_space<vmem>>, vector<8x384xf32>
    %127 = arith.truncf %124 : vector<8x128xf32> to vector<8x128xbf16>
    %cst_47 = arith.constant dense<0.000000e+00> : vector<8x384xf32>
    %128 = tpu.matmul %127, %60, %cst_47 {dimension_numbers = #tpu.dot_dimension_numbers<[1], [0], [0], [1], [0, 0, 1, 1], [], []>} : vector<8x128xbf16>, vector<128x384xbf16>, vector<8x384xf32> -> vector<8x384xf32>
    %129 = vector.extract_strided_slice %126 {offsets = [0, 0], sizes = [8, 128], strides = [1, 1]} : vector<8x384xf32> to vector<8x128xf32>
    %130 = vector.extract_strided_slice %128 {offsets = [0, 0], sizes = [8, 128], strides = [1, 1]} : vector<8x384xf32> to vector<8x128xf32>
    %131 = arith.addf %129, %130 : vector<8x128xf32>
    %132 = arith.negf %131 : vector<8x128xf32>
    %133 = math.exp %132 : vector<8x128xf32>
    %cst_48 = arith.constant 1.000000e+00 : f32
    %134 = vector.broadcast %cst_48 : f32 to vector<8x128xf32>
    %135 = arith.addf %134, %133 : vector<8x128xf32>
    %136 = arith.divf %134, %135 : vector<8x128xf32>
    %137 = vector.extract_strided_slice %126 {offsets = [0, 128], sizes = [8, 128], strides = [1, 1]} : vector<8x384xf32> to vector<8x128xf32>
    %138 = vector.extract_strided_slice %128 {offsets = [0, 128], sizes = [8, 128], strides = [1, 1]} : vector<8x384xf32> to vector<8x128xf32>
    %139 = arith.addf %137, %138 : vector<8x128xf32>
    %140 = arith.negf %139 : vector<8x128xf32>
    %141 = math.exp %140 : vector<8x128xf32>
    %cst_49 = arith.constant 1.000000e+00 : f32
    %142 = vector.broadcast %cst_49 : f32 to vector<8x128xf32>
    %143 = arith.addf %142, %141 : vector<8x128xf32>
    %144 = arith.divf %142, %143 : vector<8x128xf32>
    %145 = vector.extract_strided_slice %126 {offsets = [0, 256], sizes = [8, 128], strides = [1, 1]} : vector<8x384xf32> to vector<8x128xf32>
    %146 = vector.extract_strided_slice %128 {offsets = [0, 256], sizes = [8, 128], strides = [1, 1]} : vector<8x384xf32> to vector<8x128xf32>
    %147 = vector.broadcast %61 : vector<1x128xf32> to vector<8x128xf32>
    %148 = arith.addf %146, %147 : vector<8x128xf32>
    %149 = arith.mulf %136, %148 : vector<8x128xf32>
    %150 = arith.addf %145, %149 : vector<8x128xf32>
    %151 = math.tanh %150 : vector<8x128xf32>
    %cst_50 = arith.constant 1.000000e+00 : f32
    %152 = vector.broadcast %cst_50 : f32 to vector<8x128xf32>
    %153 = arith.subf %152, %144 : vector<8x128xf32>
    %154 = arith.mulf %153, %151 : vector<8x128xf32>
    %155 = arith.mulf %144, %124 : vector<8x128xf32>
    %156 = arith.addf %154, %155 : vector<8x128xf32>
    %c16_51 = arith.constant 16 : index
    %c0_52 = arith.constant 0 : index
    %157 = vector.load %arg16[%c16_51, %c0_52] : memref<64x128xf32, #tpu.memory_space<vmem>>, vector<8x128xf32>
    tpu.vector_store %arg16[%c16_51, %c0_52], %156 {strides = array<i32>} : memref<64x128xf32, #tpu.memory_space<vmem>>, vector<8x128xf32>,
    %c24 = arith.constant 24 : index
    %c0_53 = arith.constant 0 : index
    %158 = vector.load %arg15[%c24, %c0_53] : memref<64x384xf32, #tpu.memory_space<vmem>>, vector<8x384xf32>
    %159 = arith.truncf %156 : vector<8x128xf32> to vector<8x128xbf16>
    %cst_54 = arith.constant dense<0.000000e+00> : vector<8x384xf32>
    %160 = tpu.matmul %159, %60, %cst_54 {dimension_numbers = #tpu.dot_dimension_numbers<[1], [0], [0], [1], [0, 0, 1, 1], [], []>} : vector<8x128xbf16>, vector<128x384xbf16>, vector<8x384xf32> -> vector<8x384xf32>
    %161 = vector.extract_strided_slice %158 {offsets = [0, 0], sizes = [8, 128], strides = [1, 1]} : vector<8x384xf32> to vector<8x128xf32>
    %162 = vector.extract_strided_slice %160 {offsets = [0, 0], sizes = [8, 128], strides = [1, 1]} : vector<8x384xf32> to vector<8x128xf32>
    %163 = arith.addf %161, %162 : vector<8x128xf32>
    %164 = arith.negf %163 : vector<8x128xf32>
    %165 = math.exp %164 : vector<8x128xf32>
    %cst_55 = arith.constant 1.000000e+00 : f32
    %166 = vector.broadcast %cst_55 : f32 to vector<8x128xf32>
    %167 = arith.addf %166, %165 : vector<8x128xf32>
    %168 = arith.divf %166, %167 : vector<8x128xf32>
    %169 = vector.extract_strided_slice %158 {offsets = [0, 128], sizes = [8, 128], strides = [1, 1]} : vector<8x384xf32> to vector<8x128xf32>
    %170 = vector.extract_strided_slice %160 {offsets = [0, 128], sizes = [8, 128], strides = [1, 1]} : vector<8x384xf32> to vector<8x128xf32>
    %171 = arith.addf %169, %170 : vector<8x128xf32>
    %172 = arith.negf %171 : vector<8x128xf32>
    %173 = math.exp %172 : vector<8x128xf32>
    %cst_56 = arith.constant 1.000000e+00 : f32
    %174 = vector.broadcast %cst_56 : f32 to vector<8x128xf32>
    %175 = arith.addf %174, %173 : vector<8x128xf32>
    %176 = arith.divf %174, %175 : vector<8x128xf32>
    %177 = vector.extract_strided_slice %158 {offsets = [0, 256], sizes = [8, 128], strides = [1, 1]} : vector<8x384xf32> to vector<8x128xf32>
    %178 = vector.extract_strided_slice %160 {offsets = [0, 256], sizes = [8, 128], strides = [1, 1]} : vector<8x384xf32> to vector<8x128xf32>
    %179 = vector.broadcast %61 : vector<1x128xf32> to vector<8x128xf32>
    %180 = arith.addf %178, %179 : vector<8x128xf32>
    %181 = arith.mulf %168, %180 : vector<8x128xf32>
    %182 = arith.addf %177, %181 : vector<8x128xf32>
    %183 = math.tanh %182 : vector<8x128xf32>
    %cst_57 = arith.constant 1.000000e+00 : f32
    %184 = vector.broadcast %cst_57 : f32 to vector<8x128xf32>
    %185 = arith.subf %184, %176 : vector<8x128xf32>
    %186 = arith.mulf %185, %183 : vector<8x128xf32>
    %187 = arith.mulf %176, %156 : vector<8x128xf32>
    %188 = arith.addf %186, %187 : vector<8x128xf32>
    %c24_58 = arith.constant 24 : index
    %c0_59 = arith.constant 0 : index
    %189 = vector.load %arg16[%c24_58, %c0_59] : memref<64x128xf32, #tpu.memory_space<vmem>>, vector<8x128xf32>
    tpu.vector_store %arg16[%c24_58, %c0_59], %188 {strides = array<i32>} : memref<64x128xf32, #tpu.memory_space<vmem>>, vector<8x128xf32>,
    %c32 = arith.constant 32 : index
    %c0_60 = arith.constant 0 : index
    %190 = vector.load %arg15[%c32, %c0_60] : memref<64x384xf32, #tpu.memory_space<vmem>>, vector<8x384xf32>
    %191 = arith.truncf %188 : vector<8x128xf32> to vector<8x128xbf16>
    %cst_61 = arith.constant dense<0.000000e+00> : vector<8x384xf32>
    %192 = tpu.matmul %191, %60, %cst_61 {dimension_numbers = #tpu.dot_dimension_numbers<[1], [0], [0], [1], [0, 0, 1, 1], [], []>} : vector<8x128xbf16>, vector<128x384xbf16>, vector<8x384xf32> -> vector<8x384xf32>
    %193 = vector.extract_strided_slice %190 {offsets = [0, 0], sizes = [8, 128], strides = [1, 1]} : vector<8x384xf32> to vector<8x128xf32>
    %194 = vector.extract_strided_slice %192 {offsets = [0, 0], sizes = [8, 128], strides = [1, 1]} : vector<8x384xf32> to vector<8x128xf32>
    %195 = arith.addf %193, %194 : vector<8x128xf32>
    %196 = arith.negf %195 : vector<8x128xf32>
    %197 = math.exp %196 : vector<8x128xf32>
    %cst_62 = arith.constant 1.000000e+00 : f32
    %198 = vector.broadcast %cst_62 : f32 to vector<8x128xf32>
    %199 = arith.addf %198, %197 : vector<8x128xf32>
    %200 = arith.divf %198, %199 : vector<8x128xf32>
    %201 = vector.extract_strided_slice %190 {offsets = [0, 128], sizes = [8, 128], strides = [1, 1]} : vector<8x384xf32> to vector<8x128xf32>
    %202 = vector.extract_strided_slice %192 {offsets = [0, 128], sizes = [8, 128], strides = [1, 1]} : vector<8x384xf32> to vector<8x128xf32>
    %203 = arith.addf %201, %202 : vector<8x128xf32>
    %204 = arith.negf %203 : vector<8x128xf32>
    %205 = math.exp %204 : vector<8x128xf32>
    %cst_63 = arith.constant 1.000000e+00 : f32
    %206 = vector.broadcast %cst_63 : f32 to vector<8x128xf32>
    %207 = arith.addf %206, %205 : vector<8x128xf32>
    %208 = arith.divf %206, %207 : vector<8x128xf32>
    %209 = vector.extract_strided_slice %190 {offsets = [0, 256], sizes = [8, 128], strides = [1, 1]} : vector<8x384xf32> to vector<8x128xf32>
    %210 = vector.extract_strided_slice %192 {offsets = [0, 256], sizes = [8, 128], strides = [1, 1]} : vector<8x384xf32> to vector<8x128xf32>
    %211 = vector.broadcast %61 : vector<1x128xf32> to vector<8x128xf32>
    %212 = arith.addf %210, %211 : vector<8x128xf32>
    %213 = arith.mulf %200, %212 : vector<8x128xf32>
    %214 = arith.addf %209, %213 : vector<8x128xf32>
    %215 = math.tanh %214 : vector<8x128xf32>
    %cst_64 = arith.constant 1.000000e+00 : f32
    %216 = vector.broadcast %cst_64 : f32 to vector<8x128xf32>
    %217 = arith.subf %216, %208 : vector<8x128xf32>
    %218 = arith.mulf %217, %215 : vector<8x128xf32>
    %219 = arith.mulf %208, %188 : vector<8x128xf32>
    %220 = arith.addf %218, %219 : vector<8x128xf32>
    %c32_65 = arith.constant 32 : index
    %c0_66 = arith.constant 0 : index
    %221 = vector.load %arg16[%c32_65, %c0_66] : memref<64x128xf32, #tpu.memory_space<vmem>>, vector<8x128xf32>
    tpu.vector_store %arg16[%c32_65, %c0_66], %220 {strides = array<i32>} : memref<64x128xf32, #tpu.memory_space<vmem>>, vector<8x128xf32>,
    %c40 = arith.constant 40 : index
    %c0_67 = arith.constant 0 : index
    %222 = vector.load %arg15[%c40, %c0_67] : memref<64x384xf32, #tpu.memory_space<vmem>>, vector<8x384xf32>
    %223 = arith.truncf %220 : vector<8x128xf32> to vector<8x128xbf16>
    %cst_68 = arith.constant dense<0.000000e+00> : vector<8x384xf32>
    %224 = tpu.matmul %223, %60, %cst_68 {dimension_numbers = #tpu.dot_dimension_numbers<[1], [0], [0], [1], [0, 0, 1, 1], [], []>} : vector<8x128xbf16>, vector<128x384xbf16>, vector<8x384xf32> -> vector<8x384xf32>
    %225 = vector.extract_strided_slice %222 {offsets = [0, 0], sizes = [8, 128], strides = [1, 1]} : vector<8x384xf32> to vector<8x128xf32>
    %226 = vector.extract_strided_slice %224 {offsets = [0, 0], sizes = [8, 128], strides = [1, 1]} : vector<8x384xf32> to vector<8x128xf32>
    %227 = arith.addf %225, %226 : vector<8x128xf32>
    %228 = arith.negf %227 : vector<8x128xf32>
    %229 = math.exp %228 : vector<8x128xf32>
    %cst_69 = arith.constant 1.000000e+00 : f32
    %230 = vector.broadcast %cst_69 : f32 to vector<8x128xf32>
    %231 = arith.addf %230, %229 : vector<8x128xf32>
    %232 = arith.divf %230, %231 : vector<8x128xf32>
    %233 = vector.extract_strided_slice %222 {offsets = [0, 128], sizes = [8, 128], strides = [1, 1]} : vector<8x384xf32> to vector<8x128xf32>
    %234 = vector.extract_strided_slice %224 {offsets = [0, 128], sizes = [8, 128], strides = [1, 1]} : vector<8x384xf32> to vector<8x128xf32>
    %235 = arith.addf %233, %234 : vector<8x128xf32>
    %236 = arith.negf %235 : vector<8x128xf32>
    %237 = math.exp %236 : vector<8x128xf32>
    %cst_70 = arith.constant 1.000000e+00 : f32
    %238 = vector.broadcast %cst_70 : f32 to vector<8x128xf32>
    %239 = arith.addf %238, %237 : vector<8x128xf32>
    %240 = arith.divf %238, %239 : vector<8x128xf32>
    %241 = vector.extract_strided_slice %222 {offsets = [0, 256], sizes = [8, 128], strides = [1, 1]} : vector<8x384xf32> to vector<8x128xf32>
    %242 = vector.extract_strided_slice %224 {offsets = [0, 256], sizes = [8, 128], strides = [1, 1]} : vector<8x384xf32> to vector<8x128xf32>
    %243 = vector.broadcast %61 : vector<1x128xf32> to vector<8x128xf32>
    %244 = arith.addf %242, %243 : vector<8x128xf32>
    %245 = arith.mulf %232, %244 : vector<8x128xf32>
    %246 = arith.addf %241, %245 : vector<8x128xf32>
    %247 = math.tanh %246 : vector<8x128xf32>
    %cst_71 = arith.constant 1.000000e+00 : f32
    %248 = vector.broadcast %cst_71 : f32 to vector<8x128xf32>
    %249 = arith.subf %248, %240 : vector<8x128xf32>
    %250 = arith.mulf %249, %247 : vector<8x128xf32>
    %251 = arith.mulf %240, %220 : vector<8x128xf32>
    %252 = arith.addf %250, %251 : vector<8x128xf32>
    %c40_72 = arith.constant 40 : index
    %c0_73 = arith.constant 0 : index
    %253 = vector.load %arg16[%c40_72, %c0_73] : memref<64x128xf32, #tpu.memory_space<vmem>>, vector<8x128xf32>
    tpu.vector_store %arg16[%c40_72, %c0_73], %252 {strides = array<i32>} : memref<64x128xf32, #tpu.memory_space<vmem>>, vector<8x128xf32>,
    %c48 = arith.constant 48 : index
    %c0_74 = arith.constant 0 : index
    %254 = vector.load %arg15[%c48, %c0_74] : memref<64x384xf32, #tpu.memory_space<vmem>>, vector<8x384xf32>
    %255 = arith.truncf %252 : vector<8x128xf32> to vector<8x128xbf16>
    %cst_75 = arith.constant dense<0.000000e+00> : vector<8x384xf32>
    %256 = tpu.matmul %255, %60, %cst_75 {dimension_numbers = #tpu.dot_dimension_numbers<[1], [0], [0], [1], [0, 0, 1, 1], [], []>} : vector<8x128xbf16>, vector<128x384xbf16>, vector<8x384xf32> -> vector<8x384xf32>
    %257 = vector.extract_strided_slice %254 {offsets = [0, 0], sizes = [8, 128], strides = [1, 1]} : vector<8x384xf32> to vector<8x128xf32>
    %258 = vector.extract_strided_slice %256 {offsets = [0, 0], sizes = [8, 128], strides = [1, 1]} : vector<8x384xf32> to vector<8x128xf32>
    %259 = arith.addf %257, %258 : vector<8x128xf32>
    %260 = arith.negf %259 : vector<8x128xf32>
    %261 = math.exp %260 : vector<8x128xf32>
    %cst_76 = arith.constant 1.000000e+00 : f32
    %262 = vector.broadcast %cst_76 : f32 to vector<8x128xf32>
    %263 = arith.addf %262, %261 : vector<8x128xf32>
    %264 = arith.divf %262, %263 : vector<8x128xf32>
    %265 = vector.extract_strided_slice %254 {offsets = [0, 128], sizes = [8, 128], strides = [1, 1]} : vector<8x384xf32> to vector<8x128xf32>
    %266 = vector.extract_strided_slice %256 {offsets = [0, 128], sizes = [8, 128], strides = [1, 1]} : vector<8x384xf32> to vector<8x128xf32>
    %267 = arith.addf %265, %266 : vector<8x128xf32>
    %268 = arith.negf %267 : vector<8x128xf32>
    %269 = math.exp %268 : vector<8x128xf32>
    %cst_77 = arith.constant 1.000000e+00 : f32
    %270 = vector.broadcast %cst_77 : f32 to vector<8x128xf32>
    %271 = arith.addf %270, %269 : vector<8x128xf32>
    %272 = arith.divf %270, %271 : vector<8x128xf32>
    %273 = vector.extract_strided_slice %254 {offsets = [0, 256], sizes = [8, 128], strides = [1, 1]} : vector<8x384xf32> to vector<8x128xf32>
    %274 = vector.extract_strided_slice %256 {offsets = [0, 256], sizes = [8, 128], strides = [1, 1]} : vector<8x384xf32> to vector<8x128xf32>
    %275 = vector.broadcast %61 : vector<1x128xf32> to vector<8x128xf32>
    %276 = arith.addf %274, %275 : vector<8x128xf32>
    %277 = arith.mulf %264, %276 : vector<8x128xf32>
    %278 = arith.addf %273, %277 : vector<8x128xf32>
    %279 = math.tanh %278 : vector<8x128xf32>
    %cst_78 = arith.constant 1.000000e+00 : f32
    %280 = vector.broadcast %cst_78 : f32 to vector<8x128xf32>
    %281 = arith.subf %280, %272 : vector<8x128xf32>
    %282 = arith.mulf %281, %279 : vector<8x128xf32>
    %283 = arith.mulf %272, %252 : vector<8x128xf32>
    %284 = arith.addf %282, %283 : vector<8x128xf32>
    %c48_79 = arith.constant 48 : index
    %c0_80 = arith.constant 0 : index
    %285 = vector.load %arg16[%c48_79, %c0_80] : memref<64x128xf32, #tpu.memory_space<vmem>>, vector<8x128xf32>
    tpu.vector_store %arg16[%c48_79, %c0_80], %284 {strides = array<i32>} : memref<64x128xf32, #tpu.memory_space<vmem>>, vector<8x128xf32>,
    %c56 = arith.constant 56 : index
    %c0_81 = arith.constant 0 : index
    %286 = vector.load %arg15[%c56, %c0_81] : memref<64x384xf32, #tpu.memory_space<vmem>>, vector<8x384xf32>
    %287 = arith.truncf %284 : vector<8x128xf32> to vector<8x128xbf16>
    %cst_82 = arith.constant dense<0.000000e+00> : vector<8x384xf32>
    %288 = tpu.matmul %287, %60, %cst_82 {dimension_numbers = #tpu.dot_dimension_numbers<[1], [0], [0], [1], [0, 0, 1, 1], [], []>} : vector<8x128xbf16>, vector<128x384xbf16>, vector<8x384xf32> -> vector<8x384xf32>
    %289 = vector.extract_strided_slice %286 {offsets = [0, 0], sizes = [8, 128], strides = [1, 1]} : vector<8x384xf32> to vector<8x128xf32>
    %290 = vector.extract_strided_slice %288 {offsets = [0, 0], sizes = [8, 128], strides = [1, 1]} : vector<8x384xf32> to vector<8x128xf32>
    %291 = arith.addf %289, %290 : vector<8x128xf32>
    %292 = arith.negf %291 : vector<8x128xf32>
    %293 = math.exp %292 : vector<8x128xf32>
    %cst_83 = arith.constant 1.000000e+00 : f32
    %294 = vector.broadcast %cst_83 : f32 to vector<8x128xf32>
    %295 = arith.addf %294, %293 : vector<8x128xf32>
    %296 = arith.divf %294, %295 : vector<8x128xf32>
    %297 = vector.extract_strided_slice %286 {offsets = [0, 128], sizes = [8, 128], strides = [1, 1]} : vector<8x384xf32> to vector<8x128xf32>
    %298 = vector.extract_strided_slice %288 {offsets = [0, 128], sizes = [8, 128], strides = [1, 1]} : vector<8x384xf32> to vector<8x128xf32>
    %299 = arith.addf %297, %298 : vector<8x128xf32>
    %300 = arith.negf %299 : vector<8x128xf32>
    %301 = math.exp %300 : vector<8x128xf32>
    %cst_84 = arith.constant 1.000000e+00 : f32
    %302 = vector.broadcast %cst_84 : f32 to vector<8x128xf32>
    %303 = arith.addf %302, %301 : vector<8x128xf32>
    %304 = arith.divf %302, %303 : vector<8x128xf32>
    %305 = vector.extract_strided_slice %286 {offsets = [0, 256], sizes = [8, 128], strides = [1, 1]} : vector<8x384xf32> to vector<8x128xf32>
    %306 = vector.extract_strided_slice %288 {offsets = [0, 256], sizes = [8, 128], strides = [1, 1]} : vector<8x384xf32> to vector<8x128xf32>
    %307 = vector.broadcast %61 : vector<1x128xf32> to vector<8x128xf32>
    %308 = arith.addf %306, %307 : vector<8x128xf32>
    %309 = arith.mulf %296, %308 : vector<8x128xf32>
    %310 = arith.addf %305, %309 : vector<8x128xf32>
    %311 = math.tanh %310 : vector<8x128xf32>
    %cst_85 = arith.constant 1.000000e+00 : f32
    %312 = vector.broadcast %cst_85 : f32 to vector<8x128xf32>
    %313 = arith.subf %312, %304 : vector<8x128xf32>
    %314 = arith.mulf %313, %311 : vector<8x128xf32>
    %315 = arith.mulf %304, %284 : vector<8x128xf32>
    %316 = arith.addf %314, %315 : vector<8x128xf32>
    %c56_86 = arith.constant 56 : index
    %c0_87 = arith.constant 0 : index
    %317 = vector.load %arg16[%c56_86, %c0_87] : memref<64x128xf32, #tpu.memory_space<vmem>>, vector<8x128xf32>
    tpu.vector_store %arg16[%c56_86, %c0_87], %316 {strides = array<i32>} : memref<64x128xf32, #tpu.memory_space<vmem>>, vector<8x128xf32>,
    %c0_88 = arith.constant 0 : index
    %c0_89 = arith.constant 0 : index
    %318 = vector.load %arg16[%c0_88, %c0_89] : memref<64x128xf32, #tpu.memory_space<vmem>>, vector<64x128xf32>
    %319 = arith.truncf %318 : vector<64x128xf32> to vector<64x128xbf16>
    %c0_90 = arith.constant 0 : index
    %c0_91 = arith.constant 0 : index
    %320 = vector.load %arg11[%c0_90, %c0_91] : memref<128x128xbf16, #tpu.memory_space<vmem>>, vector<128x128xbf16>
    %cst_92 = arith.constant dense<0.000000e+00> : vector<64x128xf32>
    %321 = tpu.matmul %319, %320, %cst_92 {dimension_numbers = #tpu.dot_dimension_numbers<[1], [0], [0], [1], [0, 0, 1, 1], [], []>} : vector<64x128xbf16>, vector<128x128xbf16>, vector<64x128xf32> -> vector<64x128xf32>
    %c0_93 = arith.constant 0 : index
    %c0_94 = arith.constant 0 : index
    %322 = vector.load %arg12[%c0_93, %c0_94] : memref<1x128xf32, #tpu.memory_space<vmem>>, vector<1x128xf32>
    %323 = vector.broadcast %322 : vector<1x128xf32> to vector<64x128xf32>
    %324 = arith.addf %321, %323 : vector<64x128xf32>
    %c0_95 = arith.constant 0 : index
    %c0_96 = arith.constant 0 : index
    %325 = vector.load %arg13[%c0_95, %c0_96] : memref<64x128xf32, #tpu.memory_space<vmem>>, vector<64x128xf32>
    tpu.vector_store %arg13[%c0_95, %c0_96], %324 {strides = array<i32>} : memref<64x128xf32, #tpu.memory_space<vmem>>, vector<64x128xf32>,
    %c0_97 = arith.constant 0 : index
    %c0_98 = arith.constant 0 : index
    %326 = vector.load %arg14[%c0_97, %c0_98] : memref<8x128xf32, #tpu.memory_space<vmem>>, vector<8x128xf32>
    tpu.vector_store %arg14[%c0_97, %c0_98], %316 {strides = array<i32>} : memref<8x128xf32, #tpu.memory_space<vmem>>, vector<8x128xf32>,
    return
  }
}

</mosaic_0001>

<bundles_post_ra>
// kernel: char_decoder_head_rnn_forward.1
= control target key start
LH: loop header
LB: loop body
LE: loop exit
PB: predicated region body
PF: predicated region fallthrough
CT: control target
= control target key end

     0   :  { %v3139_v0 = vmov 0   ;;  %v3141_v5 = vmov 0.0   ;;  %vm2309_vm0 = vmmov 0   ;;  %vm72_vm1 = vcmask 261120   ;;  %s3124_s5 = inlined_call_operand.vmem [shape: s32[64,1], index: 5, kind: input, shape index: {}]   ;;  %s3125_s1 = inlined_call_operand.vmem [shape: bf16[32,128], index: 1, kind: input, shape index: {}]   ;;  %s3126_s0 = inlined_call_operand.vmem [shape: f32[8,32], index: 0, kind: input, shape index: {}]   ;;  %s3127_s6 = inlined_call_operand.vmem [shape: bf16[32,32], index: 6, kind: input, shape index: {}]   ;;  %s3128_s7 = inlined_call_operand.vmem [shape: bf16[32,384], index: 7, kind: input, shape index: {}]   ;;  %s3129_s9 = inlined_call_operand.vmem [shape: bf16[128,384], index: 9, kind: input, shape index: {}]   ;;  %s3130_s2 = inlined_call_operand.vmem [shape: f32[1,128], index: 2, kind: input, shape index: {}]   ;;  %s3131_s3 = inlined_call_operand.vmem [shape: f32[1,128], index: 3, kind: input, shape index: {}]   ;;  %s3132_s4 = inlined_call_operand.vmem [shape: f32[1,128], index: 4, kind: input, shape index: {}]   ;;  %s3133_s8 = inlined_call_operand.vmem [shape: f32[1,384], index: 8, kind: input, shape index: {}]   ;;  %s3134_s10 = inlined_call_operand.vmem [shape: f32[1,128], index: 10, kind: input, shape index: {}]   ;;  %s3135_s11 = inlined_call_operand.vmem [shape: bf16[128,128], index: 11, kind: input, shape index: {}]   ;;  %s3136_s12 = inlined_call_operand.vmem [shape: f32[1,128], index: 12, kind: input, shape index: {}]   ;;  %s3137_s13 = inlined_call_operand.vmem [shape: f32[64,128], index: 13, kind: output, shape index: {0}]   ;;  %s3138_s14 = inlined_call_operand.vmem [shape: f32[8,128], index: 14, kind: output, shape index: {1}]  }
   0x1   :  { %2150 = vset.pattern.permute.xlu1 %v3139_v0  ;;  %2149 = vset.pattern.permute.xlu0 %v3139_v0  ;;  %v162_v1 = vld [vmem:[%s3124_s5 + $0x10] sm:$0xff]  ;;  %v160_v2 = vld [vmem:[%s3124_s5] sm:$0xff]  ;;  %v163_v3 = vld [vmem:[%s3124_s5 + $0x18] sm:$0xff]  ;;  %v117_v16 = vlaneseq }
   0x2   :  { %177 = vperm.xlu1 %2150, %v162_v1   ;;  %171 = vperm.xlu0 %2149, %v160_v2   ;;  %v161_v4 = vld [vmem:[%s3124_s5 + $0x8] sm:$0xff]  ;;  %v2151_v6 = vld [vmem:[%s3125_s1] sm:$0xff]   ;;  %v167_v12 = vld [vmem:[%s3124_s5 + $0x38] sm:$0xff] }
   0x3   :  { %1930 = vmatprep.subr.bf16.mxu1 %v3141_v5  ;;  %1934 = vmatprep.mubr.msk.bf16.mxu1 %vm2309_vm0, %v3141_v5  ;;  %v165_v7 = vld [vmem:[%s3124_s5 + $0x28] sm:$0xff]  ;;  %v164_v8 = vld [vmem:[%s3124_s5 + $0x20] sm:$0xff]  ;;  %v166_v13 = vld [vmem:[%s3124_s5 + $0x30] sm:$0xff]  ;;  %v169_v17 = vand.u32 127, %v117_v16  ;;  %v2472_v50 = vshrl.u32 %v117_v16, 7 }
   0x4   :  { %420 = vmatprep.mubr.bf16.mxu0 %v3139_v0  ;;  %1931 = vmatpush3.bf16.msra.mxu1 %v2151_v6  ;;  %v2152_v9 = vld [vmem:[%s3125_s1 + $0x8] sm:$0xff]   ;;  %v47_v10 = vld [vmem:[%s3126_s0] sm:$0xff] }
   0x5   :  { %1932 = vmatprep.subr.bf16.mxu1 %v3141_v5  ;;  %v2153_v11 = vld [vmem:[%s3127_s6] sm:$0xff]   ;;  %v48_v14 = vpack.c.bf16 %v47_v10, %v47_v10  ;;  %v2154_v15 = vld [vmem:[%s3127_s6 + $0x8] sm:$0xff]   ;;  %vm119_vm10 = vcmp.lt.s32.totalorder %v2472_v50, 4 }
   0x6   :  { %180 = vperm.xlu1 %2150, %v163_v3   ;;  %174 = vperm.xlu0 %2149, %v161_v4   ;;  %v2155_v38 = vld [vmem:[%s3128_s7 + $0x4] ss:$12 sps:$4 sm:$0xff]   ;;  %v2157_v39 = vld [vmem:[%s3128_s7] ss:$12 sps:$4 sm:$0xff]   ;;  %v2158_v40 = vld [vmem:[%s3128_s7 + $0x8] ss:$12 sps:$4 sm:$0xff]  }
   0x7   :  { %388 = vmatprep.subr.bf16.mxu0 %v2155_v38  ;;  %v2159_v41 = vld [vmem:[%s3128_s7 + $0x1c] ss:$12 sps:$4 sm:$0xff]   ;;  %v2162_v42 = vld [vmem:[%s3128_s7 + $0x20] ss:$12 sps:$4 sm:$0xff]   ;;  %v2161_v43 = vld [vmem:[%s3128_s7 + $0x18] ss:$12 sps:$4 sm:$0xff]  }
   0x8   :  { %1933 = vmatpush3.bf16.msra.mxu1 %v2152_v9  ;;  %389 = vmatpush1.bf16.msra.mxu0 %v2157_v39  ;;  %v2465_v45 = vld [vmem:[%s3129_s9 + $0x4] ss:$12 sps:$4 sm:$0xff]   ;;  %v1746_v49 = vld [vmem:[%s3130_s2] ss:$0 sm:$0xff]  ;;  %v2476_v53 = vsel %vm119_vm10, 1.0, %v3141_v5 }
   0x9   :  { %1938 = vmatprep.subr.bf16.mxu1 %v2153_v11  ;;  %390 = vmatprep.subr.bf16.mxu0 %v2159_v41  ;;  %v2483_v16 = vld [vmem:[%s3129_s9] ss:$12 sps:$4 sm:$0xff]   ;;  %v2573_v38 = vld [vmem:[%s3129_s9 + $0x68] ss:$12 sps:$4 sm:$0xff]   ;;  %v2589_v41 = vld [vmem:[%s3129_s9 + $0x78] ss:$12 sps:$4 sm:$0xff]  }
   0xa   :  { %186 = vperm.xlu1 %2150, %v165_v7   ;;  %183 = vperm.xlu0 %2149, %v164_v8   ;;  %v2578_v39 = vld [vmem:[%s3129_s9 + $0x7c] ss:$12 sps:$4 sm:$0xff]  }
   0xb   :  { %1935 = vmatmul.mubr.msk.bf16.vlgmr.msra.gmra.mrb[0].mxu1 %vm72_vm1, %v48_v14 }
   0xc   :  { %1939 = vmatpush3.bf16.msra.mxu1 %v2153_v11  ;;  %391 = vmatpush1.bf16.msra.mxu0 %v2161_v43  ;;  %v2597_v43 = vld [vmem:[%s3129_s9 + $0x80] ss:$12 sps:$4 sm:$0xff]  }
   0xd   :  { %1940 = vmatprep.subr.bf16.mxu1 %v2154_v15  ;;  %715 = vmatprep.subr.bf16.mxu0 %v2465_v45 }
   0xe   :  { %192 = vperm.xlu1 %2150, %v167_v12   ;;  %189 = vperm.xlu0 %2149, %v166_v13  }
  0x10   :  { %1941 = vmatpush3.bf16.msra.mxu1 %v2154_v15 }
  0x11   :  { %1950 = vmatprep.subr.bf16.mxu1 %v2158_v40 }
  0x81   :  { %v178_v18 = vpop.permute.xlu1 %177  ;;  %v172_v19 = vpop.permute.xlu0 %171 }
  0x82   :  { %vm196_vm2 = vcmp.eq.s32.totalorder %v169_v17, %v178_v18  ;;  %vm194_vm3 = vcmp.eq.s32.totalorder %v169_v17, %v172_v19  ;;  %v2488_v18 = vld [vmem:[%s3129_s9 + $0x8] ss:$12 sps:$4 sm:$0xff]  }
  0x83   :  { %v1755_v22 = vsel %vm196_vm2, 1.0, %v3141_v5  ;;  %v1753_v23 = vsel %vm194_vm3, 1.0, %v3141_v5  ;;  %v2493_v19 = vld [vmem:[%s3129_s9 + $0x1c] ss:$12 sps:$4 sm:$0xff]  }
  0x85   :  { %v181_v20 = vpop.permute.xlu1 %180  ;;  %v175_v21 = vpop.permute.xlu0 %174 }
  0x86   :  { %vm197_vm4 = vcmp.eq.s32.totalorder %v169_v17, %v181_v20  ;;  %vm195_vm5 = vcmp.eq.s32.totalorder %v169_v17, %v175_v21  ;;  %v2502_v20 = vld [vmem:[%s3129_s9 + $0x18] ss:$12 sps:$4 sm:$0xff]  }
  0x87   :  { %v1756_v24 = vsel %vm197_vm4, 1.0, %v3141_v5  ;;  %v1754_v25 = vsel %vm195_vm5, 1.0, %v3141_v5 }
  0x88   :  { %v219_v26 = vpack.c.bf16 %v1756_v24, %v1755_v22  ;;  %v218_v27 = vpack.c.bf16 %v1754_v25, %v1753_v23  ;;  %v2509_v22 = vld [vmem:[%s3129_s9 + $0x20] ss:$12 sps:$4 sm:$0xff]  }
  0x89   :  { %v187_v28 = vpop.permute.xlu1 %186  ;;  %v184_v29 = vpop.permute.xlu0 %183  ;;  %v2514_v23 = vld [vmem:[%s3129_s9 + $0x34] ss:$12 sps:$4 sm:$0xff]  }
  0x8a   :  { %vm199_vm6 = vcmp.eq.s32.totalorder %v169_v17, %v187_v28  ;;  %vm198_vm7 = vcmp.eq.s32.totalorder %v169_v17, %v184_v29  ;;  %1942 = vmatprep.mubr.msk.bf16.mxu1 %vm72_vm1, %v218_v27  ;;  %v2522_v28 = vld [vmem:[%s3129_s9 + $0x30] ss:$12 sps:$4 sm:$0xff]  }
  0x8b   :  { %v1758_v30 = vsel %vm199_vm6, 1.0, %v3141_v5  ;;  %v1757_v31 = vsel %vm198_vm7, 1.0, %v3141_v5  ;;  %1943 = vmatmul.mubr.msk.bf16.vlgmr.msra.gmra.mrb[4].mxu1 %vm72_vm1, %v219_v26 }
  0x8c   :  { %v220_v32 = vpack.c.bf16 %v1758_v30, %v1757_v31  ;;  %1951 = vmatpush3.bf16.msra.mxu1 %v2158_v40  ;;  %v2529_v30 = vld [vmem:[%s3129_s9 + $0x38] ss:$12 sps:$4 sm:$0xff]   ;;  %v1751_v40 = vld [vmem:[%s3131_s3] ss:$0 sm:$0xff] }
  0x8d   :  { %v193_v33 = vpop.permute.xlu1 %192  ;;  %v190_v34 = vpop.permute.xlu0 %189  ;;  %1952 = vmatprep.subr.bf16.mxu1 %v2162_v42  ;;  %v2534_v31 = vld [vmem:[%s3129_s9 + $0x4c] ss:$12 sps:$4 sm:$0xff]  }
  0x8e   :  { %vm201_vm8 = vcmp.eq.s32.totalorder %v169_v17, %v193_v33  ;;  %vm200_vm9 = vcmp.eq.s32.totalorder %v169_v17, %v190_v34  ;;  %1946 = vmatprep.mubr.msk.bf16.mxu1 %vm72_vm1, %v220_v32  ;;  %v2544_v32 = vld [vmem:[%s3129_s9 + $0x48] ss:$12 sps:$4 sm:$0xff]   ;;  %v2551_v33 = vld [vmem:[%s3129_s9 + $0x50] ss:$12 sps:$4 sm:$0xff]  }
  0x8f   :  { %v1760_v35 = vsel %vm201_vm8, 1.0, %v3141_v5  ;;  %v1759_v36 = vsel %vm200_vm9, 1.0, %v3141_v5  ;;  %v2556_v34 = vld [vmem:[%s3129_s9 + $0x64] ss:$12 sps:$4 sm:$0xff]  }
  0x90   :  { %v221_v37 = vpack.c.bf16 %v1760_v35, %v1759_v36  ;;  %1953 = vmatpush3.bf16.msra.mxu1 %v2162_v42  ;;  %v2566_v36 = vld [vmem:[%s3129_s9 + $0x60] ss:$12 sps:$4 sm:$0xff]  }
  0x91   :  { %1962 = vmatprep.subr.bf16.mxu1 %v3141_v5 }
  0x93   :  { %1947 = vmatmul.mubr.msk.bf16.gmra.mrb[8].mxu1 %vm72_vm1, %v221_v37 }
  0xde   :  { %v110_v44 = vpop.f32.mrb[0].mxu1 }
  0xdf   :  { %v1936_v46 = vpop.f32.mrb[1].mxu1  ;;  %v111_v51 = vadd.f32 %v1746_v49, %v110_v44  ;;  %v2602_v44 = vld [vmem:[%s3129_s9 + $0x94] ss:$12 sps:$4 sm:$0xff]   ;;  %v2619_v49 = vld [vmem:[%s3129_s9 + $0x98] ss:$12 sps:$4 sm:$0xff]  }
  0xe0   :  { %v113_v47 = vpop.f32.mrb[2].mxu1  ;;  %v1752_v46 = vld [vmem:[%s3132_s4] ss:$0 sm:$0xff] }
  0xe1   :  { %v1937_v48 = vpop.f32.mrb[3].mxu1  ;;  %v116_v52 = vmax.f32 %v111_v51, 0.0  ;;  %v2612_v47 = vld [vmem:[%s3129_s9 + $0x90] ss:$12 sps:$4 sm:$0xff]   ;;  %v2624_v51 = vld [vmem:[%s3129_s9 + $0xac] ss:$12 sps:$4 sm:$0xff]  }
  0xe3   :  { %v122_v54 = vmul.f32 %v2476_v53, %v116_v52 }
  0xe5   :  { %v123_v55 = vrot.slane %v122_v54, 4 }
  0xe7   :  { %v124_v56 = vadd.f32 %v123_v55, %v122_v54  ;;  %v2643_v55 = vld [vmem:[%s3129_s9 + $0xb0] ss:$12 sps:$4 sm:$0xff]  }
  0xe9   :  { %v125_v57 = vrot.slane %v124_v56, 2 }
  0xeb   :  { %v126_v58 = vadd.f32 %v125_v57, %v124_v56  ;;  %v327_v57 = vld [vmem:[%s3133_s8] sm:$0x7] }
  0xed   :  { %v127_v59 = vrot.slane %v126_v58, 1 }
  0xef   :  { %v128_v60 = vadd.f32 %v127_v59, %v126_v58  ;;  %v335_v58 = vsub.s32 1, %v2472_v50  ;;  %v339_v59 = vsub.s32 2, %v2472_v50 }
  0xf1   :  { %v129_v61 = vmul.f32 0.25, %v128_v60 }
  0xf3   :  { %v130_v62 = vsub.f32 %v116_v52, %v129_v61  ;;  %v2632_v52 = vld [vmem:[%s3129_s9 + $0xa8] ss:$12 sps:$4 sm:$0xff]   ;;  %v336_v61 = vrot.slane %v327_v57, %v335_v58 }
  0xf5   :  { %v131_v63 = vmul.f32 %v2476_v53, %v130_v62 }
  0xf7   :  { %v132_v1 = vmul.f32 %v131_v63, %v131_v63 }
  0xf9   :  { %v133_v2 = vrot.slane %v132_v1, 4 }
  0xfb   :  { %v134_v3 = vadd.f32 %v133_v2, %v132_v1 }
  0xfd   :  { %v135_v4 = vrot.slane %v134_v3, 2 }
  0xff   :  { %v136_v6 = vadd.f32 %v135_v4, %v134_v3 }
 0x101   :  { %v137_v7 = vrot.slane %v136_v6, 1 }
 0x103   :  { %v138_v8 = vadd.f32 %v137_v7, %v136_v6 }
 0x105   :  { %v139_v9 = vmul.f32 0.25, %v138_v8 }
 0x107   :  { %v141_v13 = vadd.f32 1e-05, %v139_v9 }
 0x109   :  { %2203 = vrsqrt.f32 %v141_v13 }
 0x113   :  { %v2204_v35 = vpop.eup %2203 }
 0x114   :  { %v143_v37 = vmul.f32 %v2204_v35, %v130_v62  ;;  %v340_v62 = vrot.slane %v327_v57, %v339_v59 }
 0x116   :  { %v150_v42 = vmul.f32 %v1751_v40, %v143_v37 }
 0x118   :  { %v158_v48 = vadd.f32 %v1752_v46, %v150_v42 }
 0x11a   :  { %v2636_v54 = vmul.f32 %v2476_v53, %v158_v48  ;;  %v331_v53 = vsub.s32 0, %v2472_v50 }
 0x11c   :  { %v586_v56 = vpack.c.bf16 %v2636_v54, %v2636_v54  ;;  %v332_v60 = vrot.slane %v327_v57, %v331_v53 }
 0x15e   :  { %v1944_v10 = vpop.f32.mrb[4].mxu1 }
 0x15f   :  { %v284_v11 = vpop.f32.mrb[5].mxu1 }
 0x160   :  { %v1945_v12 = vpop.f32.mrb[6].mxu1 }
 0x161   :  { %v316_v14 = vpack.c.bf16 %v1945_v12, %v1944_v10  ;;  %v287_v15 = vpop.f32.mrb[7].mxu1 }
 0x162   :  { %v315_v17 = vpack.c.bf16 %v287_v15, %v284_v11 }
 0x164   :  { %1773 = vmatmul.mubr.msk.bf16.vlgmr.msra.gmra.mrb[0].mxu0 %vm72_vm1, %v315_v17  ;;  %1954 = vmatprep.mubr.msk.bf16.mxu1 %vm72_vm1, %v315_v17 }
 0x165   :  { %716 = vmatpush1.bf16.msra.mxu0 %v2483_v16  ;;  %1955 = vmatmul.mubr.msk.bf16.vlgmr.msra.gmra.mrb[12].mxu1 %vm72_vm1, %v316_v14 }
 0x166   :  { %1963 = vmatpush3.bf16.msra.mxu1 %v2488_v18  ;;  %v1948_v21 = vpop.f32.mrb[8].mxu1  ;;  %717 = vmatprep.subr.bf16.mxu0 %v2493_v19 }
 0x167   :  { %v300_v24 = vpop.f32.mrb[9].mxu1  ;;  %1964 = vmatprep.subr.bf16.mxu1 %v3141_v5  ;;  %430 = vmatprep.mubr.bf16.mxu0 %v3139_v0 }
 0x168   :  { %v1949_v25 = vpop.f32.mrb[10].mxu1 }
 0x169   :  { %v318_v26 = vpack.c.bf16 %v1949_v25, %v1948_v21  ;;  %718 = vmatpush1.bf16.msra.mxu0 %v2502_v20  ;;  %v303_v27 = vpop.f32.mrb[11].mxu1 }
 0x16a   :  { %v317_v29 = vpack.c.bf16 %v303_v27, %v300_v24  ;;  %1965 = vmatpush3.bf16.msra.mxu1 %v2509_v22  ;;  %719 = vmatprep.subr.bf16.mxu0 %v2514_v23 }
 0x16b   :  { %1966 = vmatprep.subr.bf16.mxu1 %v3141_v5 }
 0x16c   :  { %1774 = vmatmul.mubr.msk.bf16.gmra.mrb[4].mxu0 %vm72_vm1, %v316_v14  ;;  %1958 = vmatprep.mubr.msk.bf16.mxu1 %vm72_vm1, %v317_v29 }
 0x16d   :  { %720 = vmatpush1.bf16.msra.mxu0 %v2522_v28  ;;  %1959 = vmatmul.mubr.msk.bf16.gmra.mrb[16].mxu1 %vm72_vm1, %v318_v26 }
 0x16e   :  { %1967 = vmatpush3.bf16.msra.mxu1 %v2529_v30  ;;  %721 = vmatprep.subr.bf16.mxu0 %v2534_v31 }
 0x16f   :  { %1968 = vmatprep.subr.bf16.mxu1 %v3141_v5  ;;  %440 = vmatprep.mubr.bf16.mxu0 %v3139_v0 }
 0x170   :  { %1978 = vmatprep.mubr.msk.bf16.mxu1 %vm2309_vm0, %v3141_v5 }
 0x171   :  { %722 = vmatpush1.bf16.msra.mxu0 %v2544_v32 }
 0x172   :  { %1969 = vmatpush3.bf16.msra.mxu1 %v2551_v33  ;;  %723 = vmatprep.subr.bf16.mxu0 %v2556_v34 }
 0x173   :  { %1970 = vmatprep.subr.bf16.mxu1 %v3141_v5 }
 0x174   :  { %1775 = vmatmul.mubr.msk.bf16.gmra.mrb[8].mxu0 %vm72_vm1, %v317_v29 }
 0x175   :  { %724 = vmatpush1.bf16.msra.mxu0 %v2566_v36  ;;  %450 = vmatprep.mubr.bf16.mxu0 %v3139_v0 }
 0x176   :  { %1971 = vmatpush3.bf16.msra.mxu1 %v2573_v38  ;;  %725 = vmatprep.subr.bf16.mxu0 %v2578_v39 }
 0x177   :  { %1972 = vmatprep.subr.bf16.mxu1 %v3141_v5 }
 0x179   :  { %726 = vmatpush1.bf16.msra.mxu0 %v2589_v41 }
 0x17a   :  { %1973 = vmatpush3.bf16.msra.mxu1 %v2597_v43  ;;  %727 = vmatprep.subr.bf16.mxu0 %v2602_v44 }
 0x17b   :  { %1974 = vmatprep.subr.bf16.mxu1 %v3141_v5 }
 0x17c   :  { %1776 = vmatmul.mubr.msk.bf16.gmra.mrb[12].mxu0 %vm72_vm1, %v318_v26 }
 0x17d   :  { %728 = vmatpush1.bf16.msra.mxu0 %v2612_v47  ;;  %747 = vmatprep.mubr.bf16.mxu0 %v3139_v0 }
 0x17e   :  { %1975 = vmatpush3.bf16.msra.mxu1 %v2619_v49  ;;  %729 = vmatprep.subr.bf16.mxu0 %v2624_v51 }
 0x17f   :  { %1976 = vmatprep.subr.bf16.mxu1 %v3141_v5 }
 0x181   :  { %730 = vmatpush1.bf16.msra.mxu0 %v2632_v52 }
 0x182   :  { %1977 = vmatpush3.bf16.msra.mxu1 %v2643_v55  ;;  %829 = vmatprep.subr.bf16.mxu0 %v2465_v45 }
 0x183   :  { %1982 = vmatprep.subr.bf16.mxu1 %v3141_v5 }
 0x184   :  { %748 = vmatmul.mubr.bf16.vlgmr.msra.gmra.mrb[16].mxu0 %v586_v56 }
 0x185   :  { %1979 = vmatmul.mubr.bf16.vlgmr.msra.gmra.mrb[20].mxu1 %v586_v56  ;;  %830 = vmatpush1.bf16.msra.mxu0 %v2483_v16 }
 0x186   :  { %1983 = vmatpush3.bf16.msra.mxu1 %v2488_v18  ;;  %831 = vmatprep.subr.bf16.mxu0 %v2493_v19 }
 0x187   :  { %1984 = vmatprep.subr.bf16.mxu1 %v3141_v5  ;;  %861 = vmatprep.mubr.bf16.mxu0 %v3139_v0 }
 0x188   :  { %1998 = vmatprep.mubr.msk.bf16.mxu1 %vm2309_vm0, %v3141_v5 }
 0x189   :  { %832 = vmatpush1.bf16.msra.mxu0 %v2502_v20 }
 0x18a   :  { %1985 = vmatpush3.bf16.msra.mxu1 %v2509_v22  ;;  %833 = vmatprep.subr.bf16.mxu0 %v2514_v23 }
 0x18b   :  { %1986 = vmatprep.subr.bf16.mxu1 %v3141_v5 }
 0x18d   :  { %834 = vmatpush1.bf16.msra.mxu0 %v2522_v28 }
 0x18e   :  { %1987 = vmatpush3.bf16.msra.mxu1 %v2529_v30  ;;  %835 = vmatprep.subr.bf16.mxu0 %v2534_v31 }
 0x18f   :  { %1988 = vmatprep.subr.bf16.mxu1 %v3141_v5 }
 0x191   :  { %836 = vmatpush1.bf16.msra.mxu0 %v2544_v32 }
 0x192   :  { %1989 = vmatpush3.bf16.msra.mxu1 %v2551_v33  ;;  %837 = vmatprep.subr.bf16.mxu0 %v2556_v34 }
 0x193   :  { %1990 = vmatprep.subr.bf16.mxu1 %v3141_v5 }
 0x195   :  { %838 = vmatpush1.bf16.msra.mxu0 %v2566_v36 }
 0x196   :  { %1991 = vmatpush3.bf16.msra.mxu1 %v2573_v38  ;;  %839 = vmatprep.subr.bf16.mxu0 %v2578_v39 }
 0x197   :  { %1992 = vmatprep.subr.bf16.mxu1 %v3141_v5 }
 0x199   :  { %840 = vmatpush1.bf16.msra.mxu0 %v2589_v41 }
 0x19a   :  { %1993 = vmatpush3.bf16.msra.mxu1 %v2597_v43  ;;  %841 = vmatprep.subr.bf16.mxu0 %v2602_v44 }
 0x19b   :  { %1994 = vmatprep.subr.bf16.mxu1 %v3141_v5 }
 0x19d   :  { %842 = vmatpush1.bf16.msra.mxu0 %v2612_v47 }
 0x19e   :  { %1995 = vmatpush3.bf16.msra.mxu1 %v2619_v49  ;;  %843 = vmatprep.subr.bf16.mxu0 %v2624_v51 }
 0x19f   :  { %1996 = vmatprep.subr.bf16.mxu1 %v3141_v5 }
 0x1a1   :  { %844 = vmatpush1.bf16.msra.mxu0 %v2632_v52 }
 0x1a2   :  { %1997 = vmatpush3.bf16.msra.mxu1 %v2643_v55  ;;  %937 = vmatprep.subr.bf16.mxu0 %v2465_v45 }
 0x1a3   :  { %2002 = vmatprep.subr.bf16.mxu1 %v3141_v5 }
 0x237   :  { %v422_v63 = vpop.f32.mrb[0].mxu0 }
 0x238   :  { %v423_v1 = vadd.f32 %v422_v63, %v332_v60  ;;  %v424_v2 = vpop.f32.mrb[1].mxu0  ;;  %v1956_v3 = vpop.f32.mrb[12].mxu1 }
 0x239   :  { %v425_v4 = vadd.f32 %v424_v2, %v336_v61  ;;  %v2693_v6 = vadd.f32 %v1956_v3, %v340_v62  ;;  %v426_v7 = vpop.f32.mrb[2].mxu0  ;;  %v495_v8 = vpop.f32.mrb[13].mxu1 }
 0x23a   :  { %v2695_v9 = vadd.f32 %v426_v7, %v332_v60  ;;  %v2697_v10 = vadd.f32 %v495_v8, %v340_v62  ;;  %v428_v11 = vpop.f32.mrb[3].mxu0  ;;  %v1957_v12 = vpop.f32.mrb[14].mxu1 }
 0x23b   :  { %v2699_v13 = vadd.f32 %v428_v11, %v336_v61  ;;  %v2701_v50 = vadd.f32 %v1957_v12, %v340_v62  ;;  %v498_v14 = vpop.f32.mrb[15].mxu1 }
 0x23c   :  { %v2703_v15 = vadd.f32 %v498_v14, %v340_v62 }
 0x23f   :  { %v432_v17 = vpop.f32.mrb[4].mxu0 }
 0x240   :  { %v2705_v21 = vadd.f32 %v432_v17, %v332_v60  ;;  %v434_v24 = vpop.f32.mrb[5].mxu0  ;;  %v1960_v25 = vpop.f32.mrb[16].mxu1 }
 0x241   :  { %v2707_v26 = vadd.f32 %v434_v24, %v336_v61  ;;  %v2709_v27 = vadd.f32 %v1960_v25, %v340_v62  ;;  %v436_v29 = vpop.f32.mrb[6].mxu0  ;;  %v511_v35 = vpop.f32.mrb[17].mxu1 }
 0x242   :  { %v2711_v37 = vadd.f32 %v436_v29, %v332_v60  ;;  %v2713_v40 = vadd.f32 %v511_v35, %v340_v62  ;;  %v438_v42 = vpop.f32.mrb[7].mxu0  ;;  %v1961_v46 = vpop.f32.mrb[18].mxu1 }
 0x243   :  { %3143 = vst [vmem:[#allocation4_spill] sm:$0xff] %v2709_v27  ;;  %v2715_v48 = vadd.f32 %v438_v42, %v336_v61  ;;  %v2717_v56 = vadd.f32 %v1961_v46, %v340_v62  ;;  %v514_v53 = vpop.f32.mrb[19].mxu1 }
 0x244   :  { %v2719_v57 = vadd.f32 %v514_v53, %v340_v62 }
 0x245   :  { %3144 = vst [vmem:[#allocation5_spill] sm:$0xff] %v2717_v56 }
 0x247   :  { %v442_v58 = vpop.f32.mrb[8].mxu0 }
 0x248   :  { %v2721_v59 = vadd.f32 %v442_v58, %v332_v60  ;;  %v444_v63 = vpop.f32.mrb[9].mxu0 }
 0x249   :  { %v2723_v2 = vadd.f32 %v444_v63, %v336_v61  ;;  %v446_v3 = vpop.f32.mrb[10].mxu0 }
 0x24a   :  { %v2725_v7 = vadd.f32 %v446_v3, %v332_v60  ;;  %v448_v8 = vpop.f32.mrb[11].mxu0 }
 0x24b   :  { %v2727_v11 = vadd.f32 %v448_v8, %v336_v61 }
 0x24f   :  { %v452_v12 = vpop.f32.mrb[12].mxu0 }
 0x250   :  { %v2729_v14 = vadd.f32 %v452_v12, %v332_v60  ;;  %v454_v17 = vpop.f32.mrb[13].mxu0 }
 0x251   :  { %v2731_v24 = vadd.f32 %v454_v17, %v336_v61  ;;  %v456_v62 = vpop.f32.mrb[14].mxu0 }
 0x252   :  { %v2733_v25 = vadd.f32 %v456_v62, %v332_v60  ;;  %v458_v29 = vpop.f32.mrb[15].mxu0 }
 0x253   :  { %v2735_v35 = vadd.f32 %v458_v29, %v336_v61  ;;  %v2740_v61 = vld [vmem:[%s3134_s10] ss:$0 sm:$0xff] }
 0x257   :  { %v749_v42 = vpop.f32.mrb[16].mxu0 }
 0x258   :  { %v796_v46 = vadd.f32 %v749_v42, %v423_v1  ;;  %v790_v53 = vpop.f32.mrb[20].mxu1  ;;  %v751_v58 = vpop.f32.mrb[17].mxu0 }
 0x259   :  { %v803_v63 = vadd.f32 %v751_v58, %v425_v4  ;;  %v1980_v3 = vpop.f32.mrb[21].mxu1  ;;  %v753_v8 = vpop.f32.mrb[18].mxu0  ;;  %v816_v4 = vadd.f32 %v2740_v61, %v790_v53  ;;  %v3146_v53 = vmov 0  }
 0x25a   :  { %v1805_v0 = vmul.f32 -1.442695, %v796_v46  ;;  %v793_v5 = vpop.f32.mrb[22].mxu1  ;;  %v754_v12 = vpop.f32.mrb[19].mxu0 }
 0x25b   :  { %v1981_v56 = vpop.f32.mrb[23].mxu1  ;;  %v1806_v17 = vmul.f32 -1.442695, %v803_v63 }
 0x25c   :  { %2205 = vpow2.f32 %v1805_v0 }
 0x25d   :  { %2207 = vpow2.f32 %v1806_v17 }
 0x266   :  { %v2206_v27 = vpop.eup %2205 }
 0x267   :  { %v800_v60 = vadd.f32 1.0, %v2206_v27  ;;  %v2208_v62 = vpop.eup %2207 }
 0x268   :  { %v807_v1 = vadd.f32 1.0, %v2208_v62 }
 0x269   :  { %2209 = vrcp.f32 %v800_v60 }
 0x26a   :  { %2211 = vrcp.f32 %v807_v1 }
 0x273   :  { %v2210_v29 = vpop.eup %2209 }
 0x274   :  { %v817_v42 = vmul.f32 %v2210_v29, %v816_v4  ;;  %v2212_v0 = vpop.eup %2211 }
 0x275   :  { %v820_v56 = vsub.f32 1.0, %v2212_v0  ;;  %v822_v58 = vmul.f32 %v2212_v0, %v2636_v54 }
 0x276   :  { %v818_v5 = vadd.f32 %v817_v42, %v2697_v10  ;;  %v3145_v10 = vmov 0.0  }
 0x278   :  { %2213 = vtanh.f32 %v818_v5 }
 0x282   :  { %v2214_v46 = vpop.eup %2213 }
 0x283   :  { %v821_v27 = vmul.f32 %v2214_v46, %v820_v56 }
 0x285   :  { %v2745_v63 = vadd.f32 %v822_v58, %v821_v27 }
 0x287   :  { %v828_v3 = vpack.c.bf16 %v2745_v63, %v2745_v63 }
 0x289   :  { %862 = vmatmul.mubr.bf16.vlgmr.msra.gmra.mrb[20].mxu0 %v828_v3  ;;  %1999 = vmatmul.mubr.bf16.vlgmr.msra.gmra.mrb[24].mxu1 %v828_v3 }
 0x28a   :  { %938 = vmatpush1.bf16.msra.mxu0 %v2483_v16  ;;  %2003 = vmatpush3.bf16.msra.mxu1 %v2488_v18 }
 0x28b   :  { %939 = vmatprep.subr.bf16.mxu0 %v2493_v19  ;;  %2004 = vmatprep.subr.bf16.mxu1 %v3145_v10 }
 0x28c   :  { %969 = vmatprep.mubr.bf16.mxu0 %v3146_v53  ;;  %2018 = vmatprep.mubr.msk.bf16.mxu1 %vm2309_vm0, %v3145_v10 }
 0x28e   :  { %940 = vmatpush1.bf16.msra.mxu0 %v2502_v20  ;;  %2005 = vmatpush3.bf16.msra.mxu1 %v2509_v22 }
 0x28f   :  { %941 = vmatprep.subr.bf16.mxu0 %v2514_v23  ;;  %2006 = vmatprep.subr.bf16.mxu1 %v3145_v10 }
 0x292   :  { %942 = vmatpush1.bf16.msra.mxu0 %v2522_v28  ;;  %2007 = vmatpush3.bf16.msra.mxu1 %v2529_v30 }
 0x293   :  { %943 = vmatprep.subr.bf16.mxu0 %v2534_v31  ;;  %2008 = vmatprep.subr.bf16.mxu1 %v3145_v10 }
 0x296   :  { %944 = vmatpush1.bf16.msra.mxu0 %v2544_v32  ;;  %2009 = vmatpush3.bf16.msra.mxu1 %v2551_v33 }
 0x297   :  { %945 = vmatprep.subr.bf16.mxu0 %v2556_v34  ;;  %2010 = vmatprep.subr.bf16.mxu1 %v3145_v10 }
 0x29a   :  { %946 = vmatpush1.bf16.msra.mxu0 %v2566_v36  ;;  %2011 = vmatpush3.bf16.msra.mxu1 %v2573_v38 }
 0x29b   :  { %947 = vmatprep.subr.bf16.mxu0 %v2578_v39  ;;  %2012 = vmatprep.subr.bf16.mxu1 %v3145_v10 }
 0x29e   :  { %948 = vmatpush1.bf16.msra.mxu0 %v2589_v41  ;;  %2013 = vmatpush3.bf16.msra.mxu1 %v2597_v43 }
 0x29f   :  { %949 = vmatprep.subr.bf16.mxu0 %v2602_v44  ;;  %2014 = vmatprep.subr.bf16.mxu1 %v3145_v10 }
 0x2a2   :  { %950 = vmatpush1.bf16.msra.mxu0 %v2612_v47  ;;  %2015 = vmatpush3.bf16.msra.mxu1 %v2619_v49 }
 0x2a3   :  { %951 = vmatprep.subr.bf16.mxu0 %v2624_v51  ;;  %2016 = vmatprep.subr.bf16.mxu1 %v3145_v10 }
 0x2a6   :  { %952 = vmatpush1.bf16.msra.mxu0 %v2632_v52  ;;  %2017 = vmatpush3.bf16.msra.mxu1 %v2643_v55 }
 0x2a7   :  { %1045 = vmatprep.subr.bf16.mxu0 %v2465_v45  ;;  %2022 = vmatprep.subr.bf16.mxu1 %v3145_v10 }
 0x35c   :  { %v863_v54 = vpop.f32.mrb[20].mxu0  ;;  %v904_v8 = vpop.f32.mrb[24].mxu1 }
 0x35d   :  { %v910_v12 = vadd.f32 %v863_v54, %v2695_v9  ;;  %v865_v17 = vpop.f32.mrb[21].mxu0  ;;  %v2000_v60 = vpop.f32.mrb[25].mxu1  ;;  %v924_v3 = vadd.f32 %v2740_v61, %v904_v8 }
 0x35e   :  { %v917_v62 = vadd.f32 %v865_v17, %v2699_v13  ;;  %v867_v1 = vpop.f32.mrb[22].mxu0  ;;  %v907_v4 = vpop.f32.mrb[26].mxu1 }
 0x35f   :  { %v1808_v29 = vmul.f32 -1.442695, %v910_v12  ;;  %v868_v42 = vpop.f32.mrb[23].mxu0  ;;  %v2001_v5 = vpop.f32.mrb[27].mxu1 }
 0x360   :  { %v1809_v0 = vmul.f32 -1.442695, %v917_v62 }
 0x361   :  { %2215 = vpow2.f32 %v1808_v29 }
 0x362   :  { %2217 = vpow2.f32 %v1809_v0 }
 0x36b   :  { %v2216_v56 = vpop.eup %2215 }
 0x36c   :  { %v914_v46 = vadd.f32 1.0, %v2216_v56  ;;  %v2218_v27 = vpop.eup %2217 }
 0x36d   :  { %v921_v58 = vadd.f32 1.0, %v2218_v27 }
 0x36e   :  { %2219 = vrcp.f32 %v914_v46 }
 0x36f   :  { %2221 = vrcp.f32 %v921_v58 }
 0x378   :  { %v2220_v9 = vpop.eup %2219 }
 0x379   :  { %v925_v54 = vmul.f32 %v2220_v9, %v924_v3  ;;  %v2222_v17 = vpop.eup %2221 }
 0x37a   :  { %v928_v12 = vsub.f32 1.0, %v2222_v17  ;;  %v930_v62 = vmul.f32 %v2222_v17, %v2745_v63 }
 0x37b   :  { %v926_v13 = vadd.f32 %v925_v54, %v2703_v15 }
 0x37d   :  { %2223 = vtanh.f32 %v926_v13 }
 0x387   :  { %v2224_v60 = vpop.eup %2223 }
 0x388   :  { %v929_v1 = vmul.f32 %v2224_v60, %v928_v12 }
 0x38a   :  { %v2789_v4 = vadd.f32 %v930_v62, %v929_v1 }
 0x38c   :  { %v936_v29 = vpack.c.bf16 %v2789_v4, %v2789_v4 }
 0x38e   :  { %970 = vmatmul.mubr.bf16.vlgmr.msra.gmra.mrb[24].mxu0 %v936_v29  ;;  %2019 = vmatmul.mubr.bf16.vlgmr.msra.gmra.mrb[28].mxu1 %v936_v29 }
 0x38f   :  { %1046 = vmatpush1.bf16.msra.mxu0 %v2483_v16  ;;  %2023 = vmatpush3.bf16.msra.mxu1 %v2488_v18 }
 0x390   :  { %1047 = vmatprep.subr.bf16.mxu0 %v2493_v19  ;;  %2024 = vmatprep.subr.bf16.mxu1 %v3145_v10 }
 0x391   :  { %1077 = vmatprep.mubr.bf16.mxu0 %v3146_v53  ;;  %2038 = vmatprep.mubr.msk.bf16.mxu1 %vm2309_vm0, %v3145_v10 }
 0x393   :  { %1048 = vmatpush1.bf16.msra.mxu0 %v2502_v20  ;;  %2025 = vmatpush3.bf16.msra.mxu1 %v2509_v22 }
 0x394   :  { %1049 = vmatprep.subr.bf16.mxu0 %v2514_v23  ;;  %2026 = vmatprep.subr.bf16.mxu1 %v3145_v10 }
 0x397   :  { %1050 = vmatpush1.bf16.msra.mxu0 %v2522_v28  ;;  %2027 = vmatpush3.bf16.msra.mxu1 %v2529_v30 }
 0x398   :  { %1051 = vmatprep.subr.bf16.mxu0 %v2534_v31  ;;  %2028 = vmatprep.subr.bf16.mxu1 %v3145_v10 }
 0x39b   :  { %1052 = vmatpush1.bf16.msra.mxu0 %v2544_v32  ;;  %2029 = vmatpush3.bf16.msra.mxu1 %v2551_v33 }
 0x39c   :  { %1053 = vmatprep.subr.bf16.mxu0 %v2556_v34  ;;  %2030 = vmatprep.subr.bf16.mxu1 %v3145_v10 }
 0x39f   :  { %1054 = vmatpush1.bf16.msra.mxu0 %v2566_v36  ;;  %2031 = vmatpush3.bf16.msra.mxu1 %v2573_v38 }
 0x3a0   :  { %1055 = vmatprep.subr.bf16.mxu0 %v2578_v39  ;;  %2032 = vmatprep.subr.bf16.mxu1 %v3145_v10 }
 0x3a3   :  { %1056 = vmatpush1.bf16.msra.mxu0 %v2589_v41  ;;  %2033 = vmatpush3.bf16.msra.mxu1 %v2597_v43 }
 0x3a4   :  { %1057 = vmatprep.subr.bf16.mxu0 %v2602_v44  ;;  %2034 = vmatprep.subr.bf16.mxu1 %v3145_v10 }
 0x3a7   :  { %1058 = vmatpush1.bf16.msra.mxu0 %v2612_v47  ;;  %2035 = vmatpush3.bf16.msra.mxu1 %v2619_v49 }
 0x3a8   :  { %1059 = vmatprep.subr.bf16.mxu0 %v2624_v51  ;;  %2036 = vmatprep.subr.bf16.mxu1 %v3145_v10 }
 0x3ab   :  { %1060 = vmatpush1.bf16.msra.mxu0 %v2632_v52  ;;  %2037 = vmatpush3.bf16.msra.mxu1 %v2643_v55 }
 0x3ac   :  { %1153 = vmatprep.subr.bf16.mxu0 %v2465_v45  ;;  %2042 = vmatprep.subr.bf16.mxu1 %v3145_v10 }
 0x461   :  { %v971_v15 = vpop.f32.mrb[24].mxu0  ;;  %v1012_v8 = vpop.f32.mrb[28].mxu1 }
 0x462   :  { %v1018_v42 = vadd.f32 %v971_v15, %v2705_v21  ;;  %v973_v5 = vpop.f32.mrb[25].mxu0  ;;  %v2020_v0 = vpop.f32.mrb[29].mxu1  ;;  %v1032_v1 = vadd.f32 %v2740_v61, %v1012_v8 }
 0x463   :  { %v1025_v56 = vadd.f32 %v973_v5, %v2707_v26  ;;  %v975_v46 = vpop.f32.mrb[26].mxu0  ;;  %v1015_v27 = vpop.f32.mrb[30].mxu1 }
 0x464   :  { %v1810_v58 = vmul.f32 -1.442695, %v1018_v42  ;;  %v976_v3 = vpop.f32.mrb[27].mxu0  ;;  %v2021_v9 = vpop.f32.mrb[31].mxu1 }
 0x465   :  { %v1811_v54 = vmul.f32 -1.442695, %v1025_v56 }
 0x466   :  { %2225 = vpow2.f32 %v1810_v58 }
 0x467   :  { %2227 = vpow2.f32 %v1811_v54 }
 0x470   :  { %v2226_v13 = vpop.eup %2225 }
 0x471   :  { %v1022_v17 = vadd.f32 1.0, %v2226_v13  ;;  %v2228_v12 = vpop.eup %2227 }
 0x472   :  { %v1029_v60 = vadd.f32 1.0, %v2228_v12 }
 0x473   :  { %2229 = vrcp.f32 %v1022_v17 }
 0x474   :  { %2231 = vrcp.f32 %v1029_v60 }
 0x47d   :  { %v2230_v21 = vpop.eup %2229 }
 0x47e   :  { %v1033_v62 = vmul.f32 %v2230_v21, %v1032_v1  ;;  %v2232_v29 = vpop.eup %2231 }
 0x47f   :  { %v1036_v15 = vsub.f32 1.0, %v2232_v29  ;;  %v1038_v0 = vmul.f32 %v2232_v29, %v2789_v4 }
 0x480   :  { %v1034_v26 = vadd.f32 %v1033_v62, %v2693_v6 }
 0x482   :  { %2233 = vtanh.f32 %v1034_v26 }
 0x48c   :  { %v2234_v42 = vpop.eup %2233 }
 0x48d   :  { %v1037_v5 = vmul.f32 %v2234_v42, %v1036_v15 }
 0x48f   :  { %v2833_v56 = vadd.f32 %v1038_v0, %v1037_v5 }
 0x491   :  { %v1044_v46 = vpack.c.bf16 %v2833_v56, %v2833_v56 }
 0x493   :  { %1078 = vmatmul.mubr.bf16.vlgmr.msra.gmra.mrb[28].mxu0 %v1044_v46  ;;  %2039 = vmatmul.mubr.bf16.vlgmr.msra.gmra.mrb[32].mxu1 %v1044_v46 }
 0x494   :  { %1154 = vmatpush1.bf16.msra.mxu0 %v2483_v16  ;;  %2043 = vmatpush3.bf16.msra.mxu1 %v2488_v18 }
 0x495   :  { %1155 = vmatprep.subr.bf16.mxu0 %v2493_v19  ;;  %2044 = vmatprep.subr.bf16.mxu1 %v3145_v10 }
 0x496   :  { %1185 = vmatprep.mubr.bf16.mxu0 %v3146_v53  ;;  %2058 = vmatprep.mubr.msk.bf16.mxu1 %vm2309_vm0, %v3145_v10 }
 0x498   :  { %1156 = vmatpush1.bf16.msra.mxu0 %v2502_v20  ;;  %2045 = vmatpush3.bf16.msra.mxu1 %v2509_v22 }
 0x499   :  { %1157 = vmatprep.subr.bf16.mxu0 %v2514_v23  ;;  %2046 = vmatprep.subr.bf16.mxu1 %v3145_v10 }
 0x49c   :  { %1158 = vmatpush1.bf16.msra.mxu0 %v2522_v28  ;;  %2047 = vmatpush3.bf16.msra.mxu1 %v2529_v30 }
 0x49d   :  { %1159 = vmatprep.subr.bf16.mxu0 %v2534_v31  ;;  %2048 = vmatprep.subr.bf16.mxu1 %v3145_v10 }
 0x4a0   :  { %1160 = vmatpush1.bf16.msra.mxu0 %v2544_v32  ;;  %2049 = vmatpush3.bf16.msra.mxu1 %v2551_v33 }
 0x4a1   :  { %1161 = vmatprep.subr.bf16.mxu0 %v2556_v34  ;;  %2050 = vmatprep.subr.bf16.mxu1 %v3145_v10 }
 0x4a4   :  { %1162 = vmatpush1.bf16.msra.mxu0 %v2566_v36  ;;  %2051 = vmatpush3.bf16.msra.mxu1 %v2573_v38 }
 0x4a5   :  { %1163 = vmatprep.subr.bf16.mxu0 %v2578_v39  ;;  %2052 = vmatprep.subr.bf16.mxu1 %v3145_v10 }
 0x4a8   :  { %1164 = vmatpush1.bf16.msra.mxu0 %v2589_v41  ;;  %2053 = vmatpush3.bf16.msra.mxu1 %v2597_v43 }
 0x4a9   :  { %1165 = vmatprep.subr.bf16.mxu0 %v2602_v44  ;;  %2054 = vmatprep.subr.bf16.mxu1 %v3145_v10 }
 0x4ac   :  { %1166 = vmatpush1.bf16.msra.mxu0 %v2612_v47  ;;  %2055 = vmatpush3.bf16.msra.mxu1 %v2619_v49 }
 0x4ad   :  { %1167 = vmatprep.subr.bf16.mxu0 %v2624_v51  ;;  %2056 = vmatprep.subr.bf16.mxu1 %v3145_v10 }
 0x4b0   :  { %1168 = vmatpush1.bf16.msra.mxu0 %v2632_v52  ;;  %2057 = vmatpush3.bf16.msra.mxu1 %v2643_v55 }
 0x4b1   :  { %1261 = vmatprep.subr.bf16.mxu0 %v2465_v45  ;;  %2062 = vmatprep.subr.bf16.mxu1 %v3145_v10 }
 0x566   :  { %v1079_v6 = vpop.f32.mrb[28].mxu0  ;;  %v1120_v8 = vpop.f32.mrb[32].mxu1 }
 0x567   :  { %v1126_v27 = vadd.f32 %v1079_v6, %v2711_v37  ;;  %v1081_v58 = vpop.f32.mrb[29].mxu0  ;;  %v2040_v3 = vpop.f32.mrb[33].mxu1  ;;  %v1140_v29 = vadd.f32 %v2740_v61, %v1120_v8 }
 0x568   :  { %v1133_v9 = vadd.f32 %v1081_v58, %v2715_v48  ;;  %v1083_v54 = vpop.f32.mrb[30].mxu0  ;;  %v1123_v13 = vpop.f32.mrb[34].mxu1 }
 0x569   :  { %v1812_v17 = vmul.f32 -1.442695, %v1126_v27  ;;  %v1084_v12 = vpop.f32.mrb[31].mxu0  ;;  %v2041_v60 = vpop.f32.mrb[35].mxu1 }
 0x56a   :  { %v1813_v1 = vmul.f32 -1.442695, %v1133_v9 }
 0x56b   :  { %2235 = vpow2.f32 %v1812_v17 }
 0x56c   :  { %2237 = vpow2.f32 %v1813_v1 }
 0x575   :  { %v2236_v21 = vpop.eup %2235 }
 0x576   :  { %v1130_v45 = vadd.f32 1.0, %v2236_v21  ;;  %v2238_v62 = vpop.eup %2237 }
 0x577   :  { %v1137_v26 = vadd.f32 1.0, %v2238_v62 }
 0x578   :  { %2239 = vrcp.f32 %v1130_v45 }
 0x579   :  { %2241 = vrcp.f32 %v1137_v26 }
 0x582   :  { %v2240_v37 = vpop.eup %2239 }
 0x583   :  { %v1141_v15 = vmul.f32 %v2240_v37, %v1140_v29  ;;  %v2242_v42 = vpop.eup %2241 }
 0x584   :  { %v1144_v5 = vsub.f32 1.0, %v2242_v42  ;;  %v1146_v6 = vmul.f32 %v2242_v42, %v2833_v56 }
 0x585   :  { %v1142_v48 = vadd.f32 %v1141_v15, %v2701_v50  ;;  %v2917_v50 = vld [vmem:[%s3129_s9 + $0x4] ss:$12 sps:$4 sm:$0xff]  }
 0x587   :  { %2243 = vtanh.f32 %v1142_v48 }
 0x591   :  { %v2244_v0 = vpop.eup %2243 }
 0x592   :  { %v1145_v46 = vmul.f32 %v2244_v0, %v1144_v5 }
 0x594   :  { %v2877_v27 = vadd.f32 %v1146_v6, %v1145_v46 }
 0x596   :  { %v1152_v58 = vpack.c.bf16 %v2877_v27, %v2877_v27 }
 0x598   :  { %1186 = vmatmul.mubr.bf16.vlgmr.msra.gmra.mrb[32].mxu0 %v1152_v58  ;;  %2059 = vmatmul.mubr.bf16.vlgmr.msra.gmra.mrb[36].mxu1 %v1152_v58 }
 0x599   :  { %1262 = vmatpush1.bf16.msra.mxu0 %v2483_v16  ;;  %2063 = vmatpush3.bf16.msra.mxu1 %v2488_v18 }
 0x59a   :  { %1263 = vmatprep.subr.bf16.mxu0 %v2493_v19  ;;  %2064 = vmatprep.subr.bf16.mxu1 %v3145_v10 }
 0x59b   :  { %1293 = vmatprep.mubr.bf16.mxu0 %v3146_v53  ;;  %2078 = vmatprep.mubr.msk.bf16.mxu1 %vm2309_vm0, %v3145_v10 }
 0x59d   :  { %1264 = vmatpush1.bf16.msra.mxu0 %v2502_v20  ;;  %2065 = vmatpush3.bf16.msra.mxu1 %v2509_v22 }
 0x59e   :  { %1265 = vmatprep.subr.bf16.mxu0 %v2514_v23  ;;  %2066 = vmatprep.subr.bf16.mxu1 %v3145_v10 }
 0x5a1   :  { %1266 = vmatpush1.bf16.msra.mxu0 %v2522_v28  ;;  %2067 = vmatpush3.bf16.msra.mxu1 %v2529_v30 }
 0x5a2   :  { %1267 = vmatprep.subr.bf16.mxu0 %v2534_v31  ;;  %2068 = vmatprep.subr.bf16.mxu1 %v3145_v10 }
 0x5a5   :  { %1268 = vmatpush1.bf16.msra.mxu0 %v2544_v32  ;;  %2069 = vmatpush3.bf16.msra.mxu1 %v2551_v33 }
 0x5a6   :  { %1269 = vmatprep.subr.bf16.mxu0 %v2556_v34  ;;  %2070 = vmatprep.subr.bf16.mxu1 %v3145_v10 }
 0x5a9   :  { %1270 = vmatpush1.bf16.msra.mxu0 %v2566_v36  ;;  %2071 = vmatpush3.bf16.msra.mxu1 %v2573_v38 }
 0x5aa   :  { %1271 = vmatprep.subr.bf16.mxu0 %v2578_v39  ;;  %2072 = vmatprep.subr.bf16.mxu1 %v3145_v10 }
 0x5ad   :  { %1272 = vmatpush1.bf16.msra.mxu0 %v2589_v41  ;;  %2073 = vmatpush3.bf16.msra.mxu1 %v2597_v43 }
 0x5ae   :  { %1273 = vmatprep.subr.bf16.mxu0 %v2602_v44  ;;  %2074 = vmatprep.subr.bf16.mxu1 %v3145_v10 }
 0x5b1   :  { %1274 = vmatpush1.bf16.msra.mxu0 %v2612_v47  ;;  %2075 = vmatpush3.bf16.msra.mxu1 %v2619_v49 }
 0x5b2   :  { %1275 = vmatprep.subr.bf16.mxu0 %v2624_v51  ;;  %2076 = vmatprep.subr.bf16.mxu1 %v3145_v10 }
 0x5b5   :  { %1276 = vmatpush1.bf16.msra.mxu0 %v2632_v52  ;;  %2077 = vmatpush3.bf16.msra.mxu1 %v2643_v55 }
 0x5b6   :  { %1369 = vmatprep.subr.bf16.mxu0 %v2917_v50  ;;  %2082 = vmatprep.subr.bf16.mxu1 %v3145_v10 }
 0x66b   :  { %v1187_v8 = vpop.f32.mrb[32].mxu0  ;;  %v1228_v3 = vpop.f32.mrb[36].mxu1 }
 0x66c   :  { %v1234_v9 = vadd.f32 %v1187_v8, %v2721_v59  ;;  %v1189_v54 = vpop.f32.mrb[33].mxu0  ;;  %v2060_v13 = vpop.f32.mrb[37].mxu1  ;;  %v1248_v48 = vadd.f32 %v2740_v61, %v1228_v3 }
 0x66d   :  { %v1241_v17 = vadd.f32 %v1189_v54, %v2723_v2  ;;  %v1191_v12 = vpop.f32.mrb[34].mxu0  ;;  %v1231_v60 = vpop.f32.mrb[38].mxu1  ;;  %v2286_v13 = vld [vmem:[%s3129_s9] ss:$12 sps:$4 sm:$0xff]  }
 0x66e   :  { %v1814_v1 = vmul.f32 -1.442695, %v1234_v9  ;;  %v1192_v21 = vpop.f32.mrb[35].mxu0  ;;  %v2061_v45 = vpop.f32.mrb[39].mxu1  ;;  %v2289_v12 = vld [vmem:[%s3129_s9 + $0x18] ss:$12 sps:$4 sm:$0xff]  }
 0x66f   :  { %v1815_v62 = vmul.f32 -1.442695, %v1241_v17  ;;  %v2288_v17 = vld [vmem:[%s3129_s9 + $0x1c] ss:$12 sps:$4 sm:$0xff]   ;;  %v2290_v60 = vld [vmem:[%s3129_s9 + $0x20] ss:$12 sps:$4 sm:$0xff]  }
 0x670   :  { %2245 = vpow2.f32 %v1814_v1  ;;  %v2291_v1 = vld [vmem:[%s3129_s9 + $0x34] ss:$12 sps:$4 sm:$0xff]   ;;  %v2293_v21 = vld [vmem:[%s3129_s9 + $0x38] ss:$12 sps:$4 sm:$0xff]  }
 0x671   :  { %2247 = vpow2.f32 %v1815_v62  ;;  %v2294_v45 = vld [vmem:[%s3129_s9 + $0x4c] ss:$12 sps:$4 sm:$0xff]   ;;  %v2295_v62 = vld [vmem:[%s3129_s9 + $0x48] ss:$12 sps:$4 sm:$0xff]  }
 0x67a   :  { %v2246_v26 = vpop.eup %2245 }
 0x67b   :  { %v1238_v29 = vadd.f32 1.0, %v2246_v26  ;;  %v2248_v37 = vpop.eup %2247  ;;  %v2296_v26 = vld [vmem:[%s3129_s9 + $0x50] ss:$12 sps:$4 sm:$0xff]  }
 0x67c   :  { %v1245_v15 = vadd.f32 1.0, %v2248_v37  ;;  %v2298_v37 = vld [vmem:[%s3129_s9 + $0x60] ss:$12 sps:$4 sm:$0xff]  }
 0x67d   :  { %2249 = vrcp.f32 %v1238_v29  ;;  %v2297_v29 = vld [vmem:[%s3129_s9 + $0x64] ss:$12 sps:$4 sm:$0xff]  }
 0x67e   :  { %2251 = vrcp.f32 %v1245_v15  ;;  %v2299_v15 = vld [vmem:[%s3129_s9 + $0x68] ss:$12 sps:$4 sm:$0xff]  }
 0x687   :  { %v2250_v59 = vpop.eup %2249 }
 0x688   :  { %v1249_v42 = vmul.f32 %v2250_v59, %v1248_v48  ;;  %v2252_v5 = vpop.eup %2251  ;;  %v2300_v48 = vld [vmem:[%s3129_s9 + $0x7c] ss:$12 sps:$4 sm:$0xff]   ;;  %v2301_v59 = vld [vmem:[%s3129_s9 + $0x78] ss:$12 sps:$4 sm:$0xff]  }
 0x689   :  { %v1252_v0 = vsub.f32 1.0, %v2252_v5  ;;  %v1254_v58 = vmul.f32 %v2252_v5, %v2877_v27  ;;  %v2304_v5 = vld [vmem:[%s3129_s9 + $0x90] ss:$12 sps:$4 sm:$0xff]  }
 0x68a   :  { %v1250_v2 = vadd.f32 %v1249_v42, %v2713_v40  ;;  %v2302_v42 = vld [vmem:[%s3129_s9 + $0x80] ss:$12 sps:$4 sm:$0xff]  }
 0x68c   :  { %2253 = vtanh.f32 %v1250_v2  ;;  %v2303_v2 = vld [vmem:[%s3129_s9 + $0x94] ss:$12 sps:$4 sm:$0xff]  }
 0x696   :  { %v2254_v46 = vpop.eup %2253 }
 0x697   :  { %v1253_v6 = vmul.f32 %v2254_v46, %v1252_v0  ;;  %v2305_v0 = vld [vmem:[%s3129_s9 + $0x98] ss:$12 sps:$4 sm:$0xff]  }
 0x698   :  { %v2306_v46 = vld [vmem:[%s3129_s9 + $0xac] ss:$12 sps:$4 sm:$0xff]  }
 0x699   :  { %v2926_v8 = vadd.f32 %v1254_v58, %v1253_v6  ;;  %v2195_v6 = vld [vmem:[%s3135_s11] sm:$0xff]  }
 0x69b   :  { %v1260_v9 = vpack.c.bf16 %v2926_v8, %v2926_v8 }
 0x69d   :  { %1294 = vmatmul.mubr.bf16.vlgmr.msra.gmra.mrb[36].mxu0 %v1260_v9  ;;  %2079 = vmatmul.mubr.bf16.vlgmr.msra.gmra.mrb[40].mxu1 %v1260_v9 }
 0x69e   :  { %1370 = vmatpush1.bf16.msra.mxu0 %v2483_v16  ;;  %2083 = vmatpush3.bf16.msra.mxu1 %v2488_v18 }
 0x69f   :  { %1371 = vmatprep.subr.bf16.mxu0 %v2493_v19  ;;  %2084 = vmatprep.subr.bf16.mxu1 %v3145_v10 }
 0x6a0   :  { %1401 = vmatprep.mubr.bf16.mxu0 %v3146_v53  ;;  %2098 = vmatprep.mubr.msk.bf16.mxu1 %vm2309_vm0, %v3145_v10 }
 0x6a2   :  { %1372 = vmatpush1.bf16.msra.mxu0 %v2502_v20  ;;  %2085 = vmatpush3.bf16.msra.mxu1 %v2509_v22 }
 0x6a3   :  { %1373 = vmatprep.subr.bf16.mxu0 %v2514_v23  ;;  %2086 = vmatprep.subr.bf16.mxu1 %v3145_v10 }
 0x6a6   :  { %1374 = vmatpush1.bf16.msra.mxu0 %v2522_v28  ;;  %2087 = vmatpush3.bf16.msra.mxu1 %v2529_v30 }
 0x6a7   :  { %1375 = vmatprep.subr.bf16.mxu0 %v2534_v31  ;;  %2088 = vmatprep.subr.bf16.mxu1 %v3145_v10 }
 0x6aa   :  { %1376 = vmatpush1.bf16.msra.mxu0 %v2544_v32  ;;  %2089 = vmatpush3.bf16.msra.mxu1 %v2551_v33 }
 0x6ab   :  { %1377 = vmatprep.subr.bf16.mxu0 %v2556_v34  ;;  %2090 = vmatprep.subr.bf16.mxu1 %v3145_v10 }
 0x6ae   :  { %1378 = vmatpush1.bf16.msra.mxu0 %v2566_v36  ;;  %2091 = vmatpush3.bf16.msra.mxu1 %v2573_v38 }
 0x6af   :  { %1379 = vmatprep.subr.bf16.mxu0 %v2578_v39  ;;  %2092 = vmatprep.subr.bf16.mxu1 %v3145_v10 }
 0x6b2   :  { %1380 = vmatpush1.bf16.msra.mxu0 %v2589_v41  ;;  %2093 = vmatpush3.bf16.msra.mxu1 %v2597_v43 }
 0x6b3   :  { %1381 = vmatprep.subr.bf16.mxu0 %v2602_v44  ;;  %2094 = vmatprep.subr.bf16.mxu1 %v3145_v10 }
 0x6b6   :  { %1382 = vmatpush1.bf16.msra.mxu0 %v2612_v47  ;;  %2095 = vmatpush3.bf16.msra.mxu1 %v2619_v49 }
 0x6b7   :  { %1383 = vmatprep.subr.bf16.mxu0 %v2624_v51  ;;  %2096 = vmatprep.subr.bf16.mxu1 %v3145_v10 }
 0x6ba   :  { %1384 = vmatpush1.bf16.msra.mxu0 %v2632_v52  ;;  %2097 = vmatpush3.bf16.msra.mxu1 %v2643_v55 }
 0x6bb   :  { %1477 = vmatprep.subr.bf16.mxu0 %v2917_v50  ;;  %2102 = vmatprep.subr.bf16.mxu1 %v3145_v10 }
 0x770   :  { %v1295_v16 = vpop.f32.mrb[36].mxu0  ;;  %v1336_v18 = vpop.f32.mrb[40].mxu1 }
 0x771   :  { %v1342_v19 = vadd.f32 %v1295_v16, %v2725_v7  ;;  %v1297_v20 = vpop.f32.mrb[37].mxu0  ;;  %v2080_v22 = vpop.f32.mrb[41].mxu1  ;;  %v1356_v43 = vadd.f32 %v2740_v61, %v1336_v18 }
 0x772   :  { %v1349_v23 = vadd.f32 %v1297_v20, %v2727_v11  ;;  %v1299_v28 = vpop.f32.mrb[38].mxu0  ;;  %v1339_v30 = vpop.f32.mrb[42].mxu1 }
 0x773   :  { %v1816_v31 = vmul.f32 -1.442695, %v1342_v19  ;;  %v1300_v32 = vpop.f32.mrb[39].mxu0  ;;  %v2081_v33 = vpop.f32.mrb[43].mxu1 }
 0x774   :  { %v1817_v34 = vmul.f32 -1.442695, %v1349_v23 }
 0x775   :  { %2255 = vpow2.f32 %v1816_v31 }
 0x776   :  { %2257 = vpow2.f32 %v1817_v34 }
 0x77f   :  { %v2256_v36 = vpop.eup %2255 }
 0x780   :  { %v1346_v38 = vadd.f32 1.0, %v2256_v36  ;;  %v2258_v39 = vpop.eup %2257 }
 0x781   :  { %v1353_v41 = vadd.f32 1.0, %v2258_v39 }
 0x782   :  { %2259 = vrcp.f32 %v1346_v38  ;;  %v3147_v38 = vld [vmem:[#allocation4_spill] sm:$0xff] }
 0x783   :  { %2261 = vrcp.f32 %v1353_v41 }
 0x78c   :  { %v2260_v44 = vpop.eup %2259 }
 0x78d   :  { %v1357_v47 = vmul.f32 %v2260_v44, %v1356_v43  ;;  %v2262_v51 = vpop.eup %2261 }
 0x78e   :  { %v1360_v40 = vsub.f32 1.0, %v2262_v51  ;;  %v1362_v50 = vmul.f32 %v2262_v51, %v2926_v8 }
 0x78f   :  { %v1358_v49 = vadd.f32 %v1357_v47, %v2719_v57  ;;  %v2287_v57 = vld [vmem:[%s3129_s9 + $0x8] ss:$12 sps:$4 sm:$0xff]  }
 0x791   :  { %2263 = vtanh.f32 %v1358_v49 }
 0x79b   :  { %v2264_v7 = vpop.eup %2263 }
 0x79c   :  { %v1361_v11 = vmul.f32 %v2264_v7, %v1360_v40  ;;  %v2196_v40 = vld [vmem:[%s3135_s11 + $0x8] sm:$0xff]   ;;  %v1589_v7 = vpack.c.bf16 %v2789_v4, %v2745_v63  ;;  %v2199_v63 = vld [vmem:[%s3135_s11 + $0x20] sm:$0xff]  }
 0x79d   :  { %v2200_v4 = vld [vmem:[%s3135_s11 + $0x28] sm:$0xff]  }
 0x79e   :  { %v2970_v3 = vadd.f32 %v1362_v50, %v1361_v11  ;;  %v2197_v11 = vld [vmem:[%s3135_s11 + $0x10] sm:$0xff]   ;;  %v2198_v50 = vld [vmem:[%s3135_s11 + $0x18] sm:$0xff]  }
 0x7a0   :  { %v1368_v54 = vpack.c.bf16 %v2970_v3, %v2970_v3 }
 0x7a2   :  { %1402 = vmatmul.mubr.bf16.vlgmr.msra.gmra.mrb[40].mxu0 %v1368_v54  ;;  %2099 = vmatmul.mubr.bf16.vlgmr.msra.gmra.mrb[44].mxu1 %v1368_v54  ;;  %v2201_v54 = vld [vmem:[%s3135_s11 + $0x30] sm:$0xff]  }
 0x7a3   :  { %1478 = vmatpush1.bf16.msra.mxu0 %v2286_v13  ;;  %2103 = vmatpush3.bf16.msra.mxu1 %v2287_v57  ;;  %v2202_v13 = vld [vmem:[%s3135_s11 + $0x38] sm:$0xff]   ;;  %v1590_v57 = vpack.c.bf16 %v2877_v27, %v2833_v56 }
 0x7a4   :  { %1479 = vmatprep.subr.bf16.mxu0 %v2288_v17  ;;  %2104 = vmatprep.subr.bf16.mxu1 %v3145_v10  ;;  %v1591_v17 = vpack.c.bf16 %v2970_v3, %v2926_v8 }
 0x7a5   :  { %1509 = vmatprep.mubr.bf16.mxu0 %v3146_v53  ;;  %2118 = vmatprep.mubr.msk.bf16.mxu1 %vm2309_vm0, %v3145_v10  ;;  %v2292_v53 = vld [vmem:[%s3129_s9 + $0x30] ss:$12 sps:$4 sm:$0xff]  }
 0x7a7   :  { %1480 = vmatpush1.bf16.msra.mxu0 %v2289_v12  ;;  %2105 = vmatpush3.bf16.msra.mxu1 %v2290_v60 }
 0x7a8   :  { %1481 = vmatprep.subr.bf16.mxu0 %v2291_v1  ;;  %2106 = vmatprep.subr.bf16.mxu1 %v3145_v10 }
 0x7ab   :  { %1482 = vmatpush1.bf16.msra.mxu0 %v2292_v53  ;;  %2107 = vmatpush3.bf16.msra.mxu1 %v2293_v21 }
 0x7ac   :  { %1483 = vmatprep.subr.bf16.mxu0 %v2294_v45  ;;  %2108 = vmatprep.subr.bf16.mxu1 %v3145_v10 }
 0x7af   :  { %1484 = vmatpush1.bf16.msra.mxu0 %v2295_v62  ;;  %2109 = vmatpush3.bf16.msra.mxu1 %v2296_v26 }
 0x7b0   :  { %1485 = vmatprep.subr.bf16.mxu0 %v2297_v29  ;;  %2110 = vmatprep.subr.bf16.mxu1 %v3145_v10 }
 0x7b3   :  { %1486 = vmatpush1.bf16.msra.mxu0 %v2298_v37  ;;  %2111 = vmatpush3.bf16.msra.mxu1 %v2299_v15 }
 0x7b4   :  { %1487 = vmatprep.subr.bf16.mxu0 %v2300_v48  ;;  %2112 = vmatprep.subr.bf16.mxu1 %v3145_v10 }
 0x7b7   :  { %1488 = vmatpush1.bf16.msra.mxu0 %v2301_v59  ;;  %2113 = vmatpush3.bf16.msra.mxu1 %v2302_v42 }
 0x7b8   :  { %1489 = vmatprep.subr.bf16.mxu0 %v2303_v2  ;;  %2114 = vmatprep.subr.bf16.mxu1 %v3145_v10  ;;  %v3148_v2 = vld [vmem:[#allocation5_spill] sm:$0xff] }
 0x7bb   :  { %1490 = vmatpush1.bf16.msra.mxu0 %v2304_v5  ;;  %2115 = vmatpush3.bf16.msra.mxu1 %v2305_v0 }
 0x7bc   :  { %1491 = vmatprep.subr.bf16.mxu0 %v2306_v46  ;;  %2116 = vmatprep.subr.bf16.mxu1 %v3145_v10 }
 0x7bf   :  { %1492 = vmatpush1.bf16.msra.mxu0 %v2632_v52  ;;  %2117 = vmatpush3.bf16.msra.mxu1 %v2643_v55 }
 0x7c0   :  { %2122 = vmatprep.subr.bf16.mxu0 %v2195_v6 }
 0x875   :  { %v1403_v58 = vpop.f32.mrb[40].mxu0  ;;  %v1444_v9 = vpop.f32.mrb[44].mxu1 }
 0x876   :  { %v1450_v16 = vadd.f32 %v1403_v58, %v2729_v14  ;;  %v1405_v18 = vpop.f32.mrb[41].mxu0  ;;  %v2100_v19 = vpop.f32.mrb[45].mxu1  ;;  %v1464_v34 = vadd.f32 %v2740_v61, %v1444_v9 }
 0x877   :  { %v1457_v20 = vadd.f32 %v1405_v18, %v2731_v24  ;;  %v1407_v22 = vpop.f32.mrb[42].mxu0  ;;  %v1447_v23 = vpop.f32.mrb[46].mxu1 }
 0x878   :  { %v1818_v10 = vmul.f32 -1.442695, %v1450_v16  ;;  %v1408_v28 = vpop.f32.mrb[43].mxu0  ;;  %v2101_v52 = vpop.f32.mrb[47].mxu1 }
 0x879   :  { %v1819_v55 = vmul.f32 -1.442695, %v1457_v20 }
 0x87a   :  { %2265 = vpow2.f32 %v1818_v10 }
 0x87b   :  { %2267 = vpow2.f32 %v1819_v55 }
 0x884   :  { %v2266_v30 = vpop.eup %2265 }
 0x885   :  { %v1454_v31 = vadd.f32 1.0, %v2266_v30  ;;  %v2268_v32 = vpop.eup %2267 }
 0x886   :  { %v1461_v33 = vadd.f32 1.0, %v2268_v32 }
 0x887   :  { %2269 = vrcp.f32 %v1454_v31 }
 0x888   :  { %2271 = vrcp.f32 %v1461_v33 }
 0x891   :  { %v2270_v14 = vpop.eup %2269 }
 0x892   :  { %v1465_v36 = vmul.f32 %v2270_v14, %v1464_v34  ;;  %v2272_v39 = vpop.eup %2271 }
 0x893   :  { %v1468_v41 = vsub.f32 1.0, %v2272_v39  ;;  %v1470_v47 = vmul.f32 %v2272_v39, %v2970_v3 }
 0x894   :  { %v1466_v24 = vadd.f32 %v1465_v36, %v3147_v38 }
 0x896   :  { %2273 = vtanh.f32 %v1466_v24 }
 0x8a0   :  { %v2274_v43 = vpop.eup %2273 }
 0x8a1   :  { %v1469_v44 = vmul.f32 %v2274_v43, %v1468_v41 }
 0x8a3   :  { %v3057_v49 = vadd.f32 %v1470_v47, %v1469_v44 }
 0x8a5   :  { %v1476_v51 = vpack.c.bf16 %v3057_v49, %v3057_v49 }
 0x8a7   :  { %1510 = vmatmul.mubr.bf16.vlgmr.msra.gmra.mrb[44].mxu0 %v1476_v51  ;;  %2119 = vmatmul.mubr.bf16.vlgmr.msra.gmra.mrb[48].mxu1 %v1476_v51 }
 0x8a8   :  { %2123 = vmatpush3.bf16.msra.mxu0 %v2195_v6  ;;  %2138 = vmatprep.mubr.bf16.mxu0 %v1589_v7 }
 0x8a9   :  { %2124 = vmatprep.subr.bf16.mxu0 %v2196_v40 }
 0x8ac   :  { %2125 = vmatpush3.bf16.msra.mxu0 %v2196_v40 }
 0x8ad   :  { %2126 = vmatprep.subr.bf16.mxu0 %v2197_v11 }
 0x8b0   :  { %2127 = vmatpush3.bf16.msra.mxu0 %v2197_v11 }
 0x8b1   :  { %2128 = vmatprep.subr.bf16.mxu0 %v2198_v50 }
 0x8b4   :  { %2129 = vmatpush3.bf16.msra.mxu0 %v2198_v50 }
 0x8b5   :  { %2130 = vmatprep.subr.bf16.mxu0 %v2199_v63 }
 0x8b8   :  { %2131 = vmatpush3.bf16.msra.mxu0 %v2199_v63 }
 0x8b9   :  { %2132 = vmatprep.subr.bf16.mxu0 %v2200_v4 }
 0x8bc   :  { %2133 = vmatpush3.bf16.msra.mxu0 %v2200_v4 }
 0x8bd   :  { %2134 = vmatprep.subr.bf16.mxu0 %v2201_v54 }
 0x8c0   :  { %2135 = vmatpush3.bf16.msra.mxu0 %v2201_v54 }
 0x8c1   :  { %2136 = vmatprep.subr.bf16.mxu0 %v2202_v13 }
 0x8c4   :  { %2137 = vmatpush3.bf16.msra.mxu0 %v2202_v13 }
 0x8c7   :  { %2139 = vmatmul.mubr.bf16.vlgmr.msra.gmra.mrb[48].mxu0 %v1590_v57 }
 0x8c8   :  { %2142 = vmatprep.mubr.bf16.mxu0 %v1591_v17 }
 0x97a   :  { %v1511_v12 = vpop.f32.mrb[44].mxu0  ;;  %v1552_v60 = vpop.f32.mrb[48].mxu1 }
 0x97b   :  { %v1558_v1 = vadd.f32 %v1511_v12, %v2733_v25  ;;  %v1513_v53 = vpop.f32.mrb[45].mxu0  ;;  %v2120_v21 = vpop.f32.mrb[49].mxu1  ;;  %v1572_v59 = vadd.f32 %v2740_v61, %v1552_v60 }
 0x97c   :  { %v1565_v45 = vadd.f32 %v1513_v53, %v2735_v35  ;;  %v1515_v62 = vpop.f32.mrb[46].mxu0  ;;  %v1555_v26 = vpop.f32.mrb[50].mxu1  ;;  %v1822_v35 = vld [vmem:[%s3136_s12] ss:$0 sm:$0xff] }
 0x97d   :  { %v1820_v29 = vmul.f32 -1.442695, %v1558_v1  ;;  %v1516_v37 = vpop.f32.mrb[47].mxu0  ;;  %v2121_v15 = vpop.f32.mrb[51].mxu1 }
 0x97e   :  { %v1821_v56 = vmul.f32 -1.442695, %v1565_v45 }
 0x97f   :  { %2275 = vpow2.f32 %v1820_v29 }
 0x980   :  { %2277 = vpow2.f32 %v1821_v56 }
 0x989   :  { %v2276_v27 = vpop.eup %2275 }
 0x98a   :  { %v1562_v8 = vadd.f32 1.0, %v2276_v27  ;;  %v2278_v3 = vpop.eup %2277 }
 0x98b   :  { %v1569_v48 = vadd.f32 1.0, %v2278_v3 }
 0x98c   :  { %2279 = vrcp.f32 %v1562_v8 }
 0x98d   :  { %2281 = vrcp.f32 %v1569_v48 }
 0x996   :  { %v2280_v25 = vpop.eup %2279 }
 0x997   :  { %v1573_v42 = vmul.f32 %v2280_v25, %v1572_v59  ;;  %v2282_v19 = vpop.eup %2281 }
 0x998   :  { %v1576_v20 = vsub.f32 1.0, %v2282_v19  ;;  %v1578_v10 = vmul.f32 %v2282_v19, %v3057_v49 }
 0x999   :  { %v1574_v5 = vadd.f32 %v1573_v42, %v3148_v2 }
 0x99a   :  { %v2140_v0 = vpop.f32.mrb[48].mxu0 }
 0x99b   :  { %2283 = vtanh.f32 %v1574_v5  ;;  %v1707_v46 = vadd.f32 %v2140_v0, %v1822_v35  ;;  %v1698_v6 = vpop.f32.mrb[49].mxu0 }
 0x99c   :  { %v1699_v58 = vadd.f32 %v1822_v35, %v1698_v6  ;;  %v2141_v9 = vpop.f32.mrb[50].mxu0 }
 0x99d   :  { %1731 = vst [vmem:[%s3137_s13 + $0x10] sm:$0xff] %v1707_v46  ;;  %v1710_v61 = vadd.f32 %v2141_v9, %v1822_v35  ;;  %v1701_v16 = vpop.f32.mrb[51].mxu0 }
 0x99e   :  { %1729 = vst [vmem:[%s3137_s13] sm:$0xff] %v1699_v58  ;;  %v1702_v18 = vadd.f32 %v1822_v35, %v1701_v16 }
 0x99f   :  { %1732 = vst [vmem:[%s3137_s13 + $0x18] sm:$0xff] %v1710_v61 }
 0x9a0   :  { %1730 = vst [vmem:[%s3137_s13 + $0x8] sm:$0xff] %v1702_v18 }
 0x9a5   :  { %v2284_v22 = vpop.eup %2283 }
 0x9a6   :  { %v1577_v23 = vmul.f32 %v2284_v22, %v1576_v20 }
 0x9a8   :  { %v1579_v28 = vadd.f32 %v1578_v10, %v1577_v23 }
 0x9aa   :  { %v1592_v52 = vpack.c.bf16 %v1579_v28, %v3057_v49  ;;  %1737 = vst [vmem:[%s3138_s14] sm:$0xff] %v1579_v28 }
 0x9ac   :  { %2143 = vmatmul.mubr.bf16.gmra.mrb[52].mxu0 %v1592_v52 }
 0xa7f   :  { %v2144_v55 = vpop.f32.mrb[52].mxu0 }
 0xa80   :  { %v1723_v30 = vadd.f32 %v2144_v55, %v1822_v35  ;;  %v1714_v31 = vpop.f32.mrb[53].mxu0 }
 0xa81   :  { %v1715_v32 = vadd.f32 %v1822_v35, %v1714_v31  ;;  %v2145_v33 = vpop.f32.mrb[54].mxu0 }
 0xa82   :  { %1735 = vst [vmem:[%s3137_s13 + $0x30] sm:$0xff] %v1723_v30  ;;  %v1726_v34 = vadd.f32 %v2145_v33, %v1822_v35  ;;  %v1717_v14 = vpop.f32.mrb[55].mxu0 }
 0xa83   :  { %1733 = vst [vmem:[%s3137_s13 + $0x20] sm:$0xff] %v1715_v32  ;;  %v1718_v36 = vadd.f32 %v1822_v35, %v1717_v14 }
 0xa84   :  { %1736 = vst [vmem:[%s3137_s13 + $0x38] sm:$0xff] %v1726_v34 }
 0xa85   :  { %1734 = vst [vmem:[%s3137_s13 + $0x28] sm:$0xff] %v1718_v36 }

</bundles_post_ra>
